<compile_context>
chip_gen: v5e
topology: v5e:2x2
jax: 0.10.0
libtpu: 0.0.40
codegen_flags: <defaults>
</compile_context>

<pallas_src>
import functools

import jax
import jax.numpy as jnp
from jax import lax
from jax.experimental import pallas as pl
from jax.experimental.pallas import tpu as pltpu

FEAT_DIM = 512  # OSNet feature dim (backbone output), matches nn.Linear(512, 512)


def _round_up(x, m):
    return ((x + m - 1) // m) * m


def _vmem_capacity_bytes():
    """Physical VMEM per TensorCore; conservative default if the query is unavailable."""
    try:
        return int(pltpu.get_tpu_info().vmem_capacity_bytes)
    except Exception:
        return 64 * 2 ** 20  # v7x per-TC size = safest lower bound


# --------------------------------------------------------------------------------------
# Pass 1: backbone stand-in (GAP + Linear(C, 512)) -> embed Linear -> L2 normalize
# --------------------------------------------------------------------------------------
def _embed_kernel(x_ref, wp_ref, bp_ref, we_ref, be_ref, embed_ref, *, C, HW):
    tn = x_ref.shape[0]
    inv_hw = jnp.float32(1.0 / HW)

    # Backbone stand-in: per-channel global average pool + projection C -> 512.
    # C is tiny (3/4), so the contraction is accumulated as rank-1 VPU updates in f32;
    # per-channel ref loads keep the live range to one (TN, HW) f32 slab at a time.
    feat = jnp.broadcast_to(bp_ref[...], (tn, FEAT_DIM))           # (TN, 512) f32
    for c in range(C):                                             # static, C is tiny
        xc = x_ref[:, c * HW:(c + 1) * HW]                         # (TN, HW) f32
        pooled_c = jnp.sum(xc, axis=1, keepdims=True) * inv_hw     # (TN, 1)  f32
        feat = feat + pooled_c * wp_ref[c:c + 1, :]                # rank-1 update

    # embed = nn.Linear(512, 512); bf16 operands on the MXU, f32 accumulation.
    emb = jnp.dot(feat.astype(jnp.bfloat16), we_ref[...],
                  preferred_element_type=jnp.float32) + be_ref[...]      # (TN, 512) f32

    # F.normalize(p=2, dim=1): clamp ||e|| at 1e-12  <=>  clamp ||e||^2 at 1e-24.
    sumsq = jnp.sum(emb * emb, axis=1, keepdims=True)               # (TN, 1)
    inv = lax.rsqrt(jnp.maximum(sumsq, 1e-24))                      # EUP rsqrt, no divide
    embed_ref[...] = emb * inv


# --------------------------------------------------------------------------------------
# Pass 2: classifier = nn.Linear(512, num_classes), tiled (class tiles outer)
# --------------------------------------------------------------------------------------
def _classifier_kernel(emb_ref, wc_ref, bc_ref, logits_ref):
    logits_ref[...] = jnp.dot(emb_ref[...].astype(jnp.bfloat16), wc_ref[...],
                              preferred_element_type=jnp.float32) + bc_ref[...]


# --------------------------------------------------------------------------------------
# Wrappers
# --------------------------------------------------------------------------------------
def prepare_params(params):
    """One-time weight preprocessing (hoisted out of the per-call path):
    pad the classifier to a lane-dense (multiple-of-128) width and cast MXU operands
    to bf16. wp/bp stay f32 (the tiny C->512 projection runs on the VPU)."""
    wp, bp, we, be, wc, bc = params
    num_classes = wc.shape[1]

    nc_pad = _round_up(num_classes, 128)
    if nc_pad > 2048:
        tc = 2048                       # stream big classifiers in 2048-wide tiles
        nc_pad = _round_up(num_classes, tc)
    else:
        tc = nc_pad                     # one resident tile

    wc_p = wc if nc_pad == num_classes else jnp.pad(wc, ((0, 0), (0, nc_pad - num_classes)))
    bc_p = bc if nc_pad == num_classes else jnp.pad(bc, ((0, 0), (0, nc_pad - num_classes)))

    return dict(
        wp=wp.astype(jnp.float32), bp=bp.astype(jnp.float32),
        we=we.astype(jnp.bfloat16), be=be.astype(jnp.float32),
        wc=wc_p.astype(jnp.bfloat16), bc=bc_p.astype(jnp.float32),
        num_classes=num_classes, nc_pad=nc_pad, tc=tc,
    )


def reid_forward(x_nchw, prepared):
    """x_nchw: (N, C, H, W) float32. Returns (embed (N,512), logits (N,num_classes))."""
    N, C, H, W = x_nchw.shape
    HW = H * W
    row_bytes = C * HW * 4                        # one sample of x, f32

    cap = _vmem_capacity_bytes()
    usable = int(cap * 0.8)                       # ~51 MiB on v7x, ~102 MiB on v5e/v6e

    # --- batch tiling: double-buffered f32 x tile gets at most ~half the usable VMEM ---
    tn_cap = max(16, ((usable // 2) // (2 * row_bytes)) // 16 * 16)
    TN = min(256, tn_cap)                         # 256 = MXU-friendly M on v6e/v7x
    if N <= TN:
        if N >= 32:
            TN = _round_up((N + 1) // 2, 16)      # >=2 batch tiles so both v7x TCs work
        else:
            TN = _round_up(max(N, 1), 16)         # multiple of 16 (bf16 sublane packing)
    N_pad = _round_up(N, TN)
    n_bt = N_pad // TN

    # x: free reshape to a dense (batch, C*HW) layout -- no cast, no transpose.
    x2 = x_nchw.reshape(N, C * HW)
    if N_pad != N:
        x2 = jnp.pad(x2, ((0, N_pad - N), (0, 0)))

    # ------------------------- pass 1: embeddings --------------------------------------
    p1_need = (2 * TN * C * HW * 4                 # x tile, double-buffered
               + 2 * TN * FEAT_DIM * 4             # embed out tile, double-buffered
               + 2 * (C * FEAT_DIM * 4 + FEAT_DIM * 4)        # wp, bp
               + 2 * (FEAT_DIM * FEAT_DIM * 2 + FEAT_DIM * 4) # we (bf16), be
               + 2 * TN * FEAT_DIM * 4)            # feat/emb f32 temporaries
    p1_vmem = int(min(usable, max(p1_need + 8 * 2 ** 20, 16 * 2 ** 20)))

    embed = pl.pallas_call(
        functools.partial(_embed_kernel, C=C, HW=HW),
        out_shape=jax.ShapeDtypeStruct((N_pad, FEAT_DIM), jnp.float32),
        grid=(n_bt,),
        in_specs=[
            pl.BlockSpec((TN, C * HW), lambda i: (i, 0)),            # x: per batch tile
            pl.BlockSpec((C, FEAT_DIM), lambda i: (0, 0)),           # wp: resident
            pl.BlockSpec((1, FEAT_DIM), lambda i: (0, 0)),           # bp: resident
            pl.BlockSpec((FEAT_DIM, FEAT_DIM), lambda i: (0, 0)),    # we: resident
            pl.BlockSpec((1, FEAT_DIM), lambda i: (0, 0)),           # be: resident
        ],
        out_specs=pl.BlockSpec((TN, FEAT_DIM), lambda i: (i, 0)),
        compiler_params=pltpu.CompilerParams(
            dimension_semantics=("parallel",),
            vmem_limit_bytes=p1_vmem,
        ),
    )(x2, prepared["wp"], prepared["bp"], prepared["we"], prepared["be"])

    # ------------------------- pass 2: classifier --------------------------------------
    nc_pad, TC = prepared["nc_pad"], prepared["tc"]
    n_ct = nc_pad // TC

    p2_need = 2 * (TN * FEAT_DIM * 4 + FEAT_DIM * TC * 2 + TC * 4 + TN * TC * 4)
    p2_vmem = int(min(usable, max(p2_need + 8 * 2 ** 20, 16 * 2 ** 20)))

    logits = pl.pallas_call(
        _classifier_kernel,
        out_shape=jax.ShapeDtypeStruct((N_pad, nc_pad), jnp.float32),
        # class tiles OUTER, batch tiles inner: each wc/bc tile is DMA'd from HBM once.
        grid=(n_ct, n_bt),
        in_specs=[
            pl.BlockSpec((TN, FEAT_DIM), lambda j, i: (i, 0)),        # embed: per batch tile
            pl.BlockSpec((FEAT_DIM, TC), lambda j, i: (0, j)),        # wc: per class tile
            pl.BlockSpec((1, TC), lambda j, i: (0, j)),               # bc: per class tile
        ],
        out_specs=pl.BlockSpec((TN, TC), lambda j, i: (i, j)),        # lane-dense logits
        compiler_params=pltpu.CompilerParams(
            dimension_semantics=("parallel", "parallel"),
            vmem_limit_bytes=p2_vmem,
        ),
    )(embed, prepared["wc"], prepared["bc"])

    return embed[:N], logits[:N, :prepared["num_classes"]]


def init_params(key, in_channels, num_classes):
    """Deterministic PyTorch-Linear-style init: U(-1/sqrt(fan_in), 1/sqrt(fan_in)).
    Weights returned already transposed to (in, out); biases as (1, out)."""
    ks = jax.random.split(key, 6)

    def lin(kw, kb, fan_in, fan_out):
        bound = 1.0 / jnp.sqrt(jnp.float32(fan_in))
        w = jax.random.uniform(kw, (fan_in, fan_out), jnp.float32, -bound, bound)
        b = jax.random.uniform(kb, (1, fan_out), jnp.float32, -bound, bound)
        return w, b

    wp, bp = lin(ks[0], ks[1], in_channels, FEAT_DIM)   # backbone stand-in proj
    we, be = lin(ks[2], ks[3], FEAT_DIM, FEAT_DIM)      # self.embed
    wc, bc = lin(ks[4], ks[5], FEAT_DIM, num_classes)   # self.classifier
    return wp, bp, we, be, wc, bc


if __name__ == "__main__":
    N, C, H, W = 2, 4, 16, 16
    num_classes = 16

    root = jax.random.PRNGKey(0)
    k_x, k_p = jax.random.split(root)

    x = jax.random.normal(k_x, (N, C, H, W), dtype=jnp.float32)
    params = init_params(k_p, C, num_classes)
    prepared = prepare_params(params)   # one-time weight preprocessing (hoisted)

    embed, logits = reid_forward(x, prepared)
    jax.block_until_ready((embed, logits))

    assert embed.shape == (N, FEAT_DIM)
    assert logits.shape == (N, num_classes)
    # embeddings must be unit-norm after F.normalize(p=2, dim=1)
    norms = jnp.linalg.norm(embed, axis=1)
    assert bool(jnp.all(jnp.abs(norms - 1.0) < 1e-3))

    print("KERNEL_OK")
</pallas_src>

<mosaic_0001>
module attributes {stable_mosaic.version = 11 : i64} {
  func.func @_embed_kernel(%arg0: i32, %arg1: memref<16x1024xf32, #tpu.memory_space<vmem>>, %arg2: memref<4x512xf32, #tpu.memory_space<vmem>>, %arg3: memref<1x512xf32, #tpu.memory_space<vmem>>, %arg4: memref<512x512xbf16, #tpu.memory_space<vmem>>, %arg5: memref<1x512xf32, #tpu.memory_space<vmem>>, %arg6: memref<16x512xf32, #tpu.memory_space<vmem>>) attributes {dimension_semantics = [#tpu.dimension_semantics<parallel>], iteration_bounds = array<i64: 1>, scalar_prefetch = 0 : i64, scratch_operands = 0 : i64, tpu.core_type = #tpu.core_type<tc>, window_params = [{transform_indices = @transform_0, window_bounds = array<i64: 16, 1024>}, {pipeline_mode = #tpu.pipeline_mode<synchronous>, transform_indices = @transform_1, window_bounds = array<i64: 4, 512>}, {pipeline_mode = #tpu.pipeline_mode<synchronous>, transform_indices = @transform_2, window_bounds = array<i64: 1, 512>}, {pipeline_mode = #tpu.pipeline_mode<synchronous>, transform_indices = @transform_3, window_bounds = array<i64: 512, 512>}, {pipeline_mode = #tpu.pipeline_mode<synchronous>, transform_indices = @transform_4, window_bounds = array<i64: 1, 512>}, {transform_indices = @transform_5, window_bounds = array<i64: 16, 512>}]} {
    %c0 = arith.constant 0 : index
    %c0_0 = arith.constant 0 : index
    %0 = vector.load %arg3[%c0, %c0_0] : memref<1x512xf32, #tpu.memory_space<vmem>>, vector<1x512xf32>
    %1 = vector.shape_cast %0 : vector<1x512xf32> to vector<1x512xf32>
    %2 = vector.broadcast %1 : vector<1x512xf32> to vector<16x512xf32>
    %c0_1 = arith.constant 0 : index
    %c0_2 = arith.constant 0 : index
    %3 = vector.load %arg1[%c0_1, %c0_2] : memref<16x1024xf32, #tpu.memory_space<vmem>>, vector<16x256xf32>
    %cst = arith.constant dense<0.000000e+00> : vector<16xf32>
    %4 = vector.multi_reduction <add>, %3, %cst [1] : vector<16x256xf32> to vector<16xf32>
    %5 = vector.shape_cast %4 : vector<16xf32> to vector<16x1xf32>
    %cst_3 = arith.constant 3.906250e-03 : f32
    %6 = vector.broadcast %cst_3 : f32 to vector<16x1xf32>
    %7 = arith.mulf %5, %6 : vector<16x1xf32>
    %c0_4 = arith.constant 0 : index
    %c0_5 = arith.constant 0 : index
    %8 = vector.load %arg2[%c0_4, %c0_5] : memref<4x512xf32, #tpu.memory_space<vmem>>, vector<1x512xf32>
    %9 = vector.broadcast %7 : vector<16x1xf32> to vector<16x512xf32>
    %10 = vector.broadcast %8 : vector<1x512xf32> to vector<16x512xf32>
    %11 = arith.mulf %9, %10 : vector<16x512xf32>
    %12 = arith.addf %2, %11 : vector<16x512xf32>
    %c0_6 = arith.constant 0 : index
    %c256 = arith.constant 256 : index
    %13 = vector.load %arg1[%c0_6, %c256] : memref<16x1024xf32, #tpu.memory_space<vmem>>, vector<16x256xf32>
    %cst_7 = arith.constant dense<0.000000e+00> : vector<16xf32>
    %14 = vector.multi_reduction <add>, %13, %cst_7 [1] : vector<16x256xf32> to vector<16xf32>
    %15 = vector.shape_cast %14 : vector<16xf32> to vector<16x1xf32>
    %cst_8 = arith.constant 3.906250e-03 : f32
    %16 = vector.broadcast %cst_8 : f32 to vector<16x1xf32>
    %17 = arith.mulf %15, %16 : vector<16x1xf32>
    %c1 = arith.constant 1 : index
    %c0_9 = arith.constant 0 : index
    %18 = vector.load %arg2[%c1, %c0_9] : memref<4x512xf32, #tpu.memory_space<vmem>>, vector<1x512xf32>
    %19 = vector.broadcast %17 : vector<16x1xf32> to vector<16x512xf32>
    %20 = vector.broadcast %18 : vector<1x512xf32> to vector<16x512xf32>
    %21 = arith.mulf %19, %20 : vector<16x512xf32>
    %22 = arith.addf %12, %21 : vector<16x512xf32>
    %c0_10 = arith.constant 0 : index
    %c512 = arith.constant 512 : index
    %23 = vector.load %arg1[%c0_10, %c512] : memref<16x1024xf32, #tpu.memory_space<vmem>>, vector<16x256xf32>
    %cst_11 = arith.constant dense<0.000000e+00> : vector<16xf32>
    %24 = vector.multi_reduction <add>, %23, %cst_11 [1] : vector<16x256xf32> to vector<16xf32>
    %25 = vector.shape_cast %24 : vector<16xf32> to vector<16x1xf32>
    %cst_12 = arith.constant 3.906250e-03 : f32
    %26 = vector.broadcast %cst_12 : f32 to vector<16x1xf32>
    %27 = arith.mulf %25, %26 : vector<16x1xf32>
    %c2 = arith.constant 2 : index
    %c0_13 = arith.constant 0 : index
    %28 = vector.load %arg2[%c2, %c0_13] : memref<4x512xf32, #tpu.memory_space<vmem>>, vector<1x512xf32>
    %29 = vector.broadcast %27 : vector<16x1xf32> to vector<16x512xf32>
    %30 = vector.broadcast %28 : vector<1x512xf32> to vector<16x512xf32>
    %31 = arith.mulf %29, %30 : vector<16x512xf32>
    %32 = arith.addf %22, %31 : vector<16x512xf32>
    %c0_14 = arith.constant 0 : index
    %c768 = arith.constant 768 : index
    %33 = vector.load %arg1[%c0_14, %c768] : memref<16x1024xf32, #tpu.memory_space<vmem>>, vector<16x256xf32>
    %cst_15 = arith.constant dense<0.000000e+00> : vector<16xf32>
    %34 = vector.multi_reduction <add>, %33, %cst_15 [1] : vector<16x256xf32> to vector<16xf32>
    %35 = vector.shape_cast %34 : vector<16xf32> to vector<16x1xf32>
    %cst_16 = arith.constant 3.906250e-03 : f32
    %36 = vector.broadcast %cst_16 : f32 to vector<16x1xf32>
    %37 = arith.mulf %35, %36 : vector<16x1xf32>
    %c3 = arith.constant 3 : index
    %c0_17 = arith.constant 0 : index
    %38 = vector.load %arg2[%c3, %c0_17] : memref<4x512xf32, #tpu.memory_space<vmem>>, vector<1x512xf32>
    %39 = vector.broadcast %37 : vector<16x1xf32> to vector<16x512xf32>
    %40 = vector.broadcast %38 : vector<1x512xf32> to vector<16x512xf32>
    %41 = arith.mulf %39, %40 : vector<16x512xf32>
    %42 = arith.addf %32, %41 : vector<16x512xf32>
    %43 = arith.truncf %42 : vector<16x512xf32> to vector<16x512xbf16>
    %c0_18 = arith.constant 0 : index
    %c0_19 = arith.constant 0 : index
    %44 = vector.load %arg4[%c0_18, %c0_19] : memref<512x512xbf16, #tpu.memory_space<vmem>>, vector<512x512xbf16>
    %cst_20 = arith.constant dense<0.000000e+00> : vector<16x512xf32>
    %45 = tpu.matmul %43, %44, %cst_20 {dimension_numbers = #tpu.dot_dimension_numbers<[1], [0], [0], [1], [0, 0, 1, 1], [], []>} : vector<16x512xbf16>, vector<512x512xbf16>, vector<16x512xf32> -> vector<16x512xf32>
    %c0_21 = arith.constant 0 : index
    %c0_22 = arith.constant 0 : index
    %46 = vector.load %arg5[%c0_21, %c0_22] : memref<1x512xf32, #tpu.memory_space<vmem>>, vector<1x512xf32>
    %47 = vector.broadcast %46 : vector<1x512xf32> to vector<16x512xf32>
    %48 = arith.addf %45, %47 : vector<16x512xf32>
    %49 = arith.mulf %48, %48 : vector<16x512xf32>
    %cst_23 = arith.constant dense<0.000000e+00> : vector<16xf32>
    %50 = vector.multi_reduction <add>, %49, %cst_23 [1] : vector<16x512xf32> to vector<16xf32>
    %51 = vector.shape_cast %50 : vector<16xf32> to vector<16x1xf32>
    %cst_24 = arith.constant 1.000000e-24 : f32
    %52 = vector.broadcast %cst_24 : f32 to vector<16x1xf32>
    %53 = arith.maximumf %51, %52 : vector<16x1xf32>
    %54 = math.rsqrt %53 : vector<16x1xf32>
    %55 = vector.broadcast %54 : vector<16x1xf32> to vector<16x512xf32>
    %56 = arith.mulf %48, %55 : vector<16x512xf32>
    %c0_25 = arith.constant 0 : index
    %c0_26 = arith.constant 0 : index
    %57 = vector.load %arg6[%c0_25, %c0_26] : memref<16x512xf32, #tpu.memory_space<vmem>>, vector<16x512xf32>
    tpu.vector_store %arg6[%c0_25, %c0_26], %56 {strides = array<i32>} : memref<16x512xf32, #tpu.memory_space<vmem>>, vector<16x512xf32>,
    return
  }
  func.func @transform_0(%arg0: i32) -> (i32, i32) {
    %c0_i32 = arith.constant 0 : i32
    %c0_i32_0 = arith.constant 0 : i32
    return %arg0, %c0_i32 : i32, i32
  }
  func.func @transform_1(%arg0: i32) -> (i32, i32) {
    %c0_i32 = arith.constant 0 : i32
    %c0_i32_0 = arith.constant 0 : i32
    %c0_i32_1 = arith.constant 0 : i32
    return %c0_i32, %c0_i32_0 : i32, i32
  }
  func.func @transform_2(%arg0: i32) -> (i32, i32) {
    %c0_i32 = arith.constant 0 : i32
    %c0_i32_0 = arith.constant 0 : i32
    %c0_i32_1 = arith.constant 0 : i32
    return %c0_i32, %c0_i32_0 : i32, i32
  }
  func.func @transform_3(%arg0: i32) -> (i32, i32) {
    %c0_i32 = arith.constant 0 : i32
    %c0_i32_0 = arith.constant 0 : i32
    %c0_i32_1 = arith.constant 0 : i32
    return %c0_i32, %c0_i32_0 : i32, i32
  }
  func.func @transform_4(%arg0: i32) -> (i32, i32) {
    %c0_i32 = arith.constant 0 : i32
    %c0_i32_0 = arith.constant 0 : i32
    %c0_i32_1 = arith.constant 0 : i32
    return %c0_i32, %c0_i32_0 : i32, i32
  }
  func.func @transform_5(%arg0: i32) -> (i32, i32) {
    %c0_i32 = arith.constant 0 : i32
    %c0_i32_0 = arith.constant 0 : i32
    return %arg0, %c0_i32 : i32, i32
  }
}

</mosaic_0001>

<bundles_post_ra>
// kernel: tpu_custom_call.1
= control target key start
LH: loop header
LB: loop body
LE: loop exit
PB: predicated region body
PF: predicated region fallthrough
CT: control target
= control target key end

     0   :  { %10 = vsyncpa [#allocation3], 0  ;;  %s2268_s0 = inlined_call_operand.hbm [shape: f32[16,1024], index: 0, kind: input, shape index: {}]   ;;  %s2269_s1 = inlined_call_operand.hbm [shape: f32[4,512], index: 1, kind: input, shape index: {}]   ;;  %s2270_s2 = inlined_call_operand.hbm [shape: f32[1,512], index: 2, kind: input, shape index: {}]   ;;  %s2271_s3 = inlined_call_operand.hbm [shape: bf16[512,512], index: 3, kind: input, shape index: {}]   ;;  %s2272_s4 = inlined_call_operand.hbm [shape: f32[1,512], index: 4, kind: input, shape index: {}]   ;;  %s2273_s5 = inlined_call_operand.hbm [shape: f32[16,512], index: 5, kind: output, shape index: {}]  }
   0x1   :  { %11 = vsyncpa [#allocation6], 0 }
   0x2   :  { %12 = vsyncpa [#allocation9], 0  ;;  %s32_s20 = sshll.u32 %s2269_s1, 4  ;;  %s33_s20 = int_to_ptr.hbm [resolvable:$true] %s32_s20 }
   0x3   :  { %13 = vsyncpa [#allocation4], 0  ;;  %s2149_s21 = smov [#allocation5]   ;;  %s53_s25 = sshll.u32 %s2271_s3, 4  ;;  %s54_s25 = int_to_ptr.hbm [resolvable:$true] %s53_s25 }
   0x4   :  { %s34_s22 = sshll.u32 %s2149_s21, 4  ;;  %s2150_s26 = smov [#allocation8]   ;;  %s35_s22 = int_to_ptr.vmem [resolvable:$true] %s34_s22 }
   0x5   :  { %37 = dma.hbm_to_vmem [thread:$0]  %s33_s20, 256, %s35_s22, [#allocation6]  }
   0x6   :  { %s55_s27 = sshll.u32 %s2150_s26, 4  ;;  %s2151_s28 = smov 256   ;;  %s56_s27 = int_to_ptr.vmem [resolvable:$true] %s55_s27 }
   0x7   :  { %s2152_s29 = smov 16   ;;  %s18_s1 = sshll.u32 %s2268_s0, 4  ;;  %s19_s1 = int_to_ptr.hbm [resolvable:$true] %s18_s1 }
   0x8   :  { %61 = dma.hbm_to_vmem [thread:$0]  %s54_s25, 16384, %s56_s27, [#allocation9], %s2151_s28, %s2151_s28, %s2152_s29  }
   0x9   :  { %s2153_s7 = smov [#allocation2]   ;;  %s43_s3 = sshll.u32 %s2270_s2, 4  ;;  %s44_s3 = int_to_ptr.hbm [resolvable:$true] %s43_s3 }
   0xa   :  { %s20_s8 = sshll.u32 %s2153_s7, 4  ;;  %s2154_s11 = smov 1024   ;;  %s21_s8 = int_to_ptr.vmem [resolvable:$true] %s20_s8 }
   0xb   :  { %s2155_s12 = smov 64   ;;  %s2156_s13 = smov [#allocation7]  }
   0xc   :  { %26 = dma.hbm_to_vmem [thread:$0]  %s19_s1, 2048, %s21_s8, [#allocation3], %s2154_s11, %s2154_s11, %s2155_s12  }
   0xd   :  { %s45_s14 = sshll.u32 %s2156_s13, 4  ;;  %s67_s17 = sshll.u32 %s2272_s4, 4  ;;  %s46_s14 = int_to_ptr.vmem [resolvable:$true] %s45_s14  ;;  %s68_s17 = int_to_ptr.hbm [resolvable:$true] %s67_s17 }
   0xe   :  { %48 = dma.hbm_to_vmem [thread:$0]  %s44_s3, 64, %s46_s14, [#allocation6]  }
   0xf   :  { %s2157_s0 = smov [#allocation10]  }
  0x10   :  { %s69_s18 = sshll.u32 %s2157_s0, 4  ;;  %s70_s18 = int_to_ptr.vmem [resolvable:$true] %s69_s18 }
  0x11   :  { %72 = dma.hbm_to_vmem [thread:$0]  %s68_s17, 64, %s70_s18, [#allocation9]  }
  0x12   :  { %2141 = dma.done.wait [#allocation3], 2048  }
  0x13   :  { %2142 = vsyncadd [#allocation3], 4294965248 }
  0x14   :  { %2143 = dma.done.wait [#allocation6], 320  }
  0x15   :  { %2144 = vsyncadd [#allocation6], 4294966976 }
  0x16   :  { %2145 = dma.done.wait [#allocation9], 16448  }
  0x17   :  { %2146 = vsyncadd [#allocation9], 4294950848  ;;  %v141_v0 = vld [vmem:[#allocation2 + $0x10] sm:$0xff]  ;;  %v142_v1 = vld [vmem:[#allocation2 + $0x18] sm:$0xff]  ;;  %s2158_s2 = smov [#allocation11]   ;;  %s1326_s21 = sshll.u32 %s2273_s5, 4  ;;  %s1327_s21 = int_to_ptr.hbm [resolvable:$true] %s1326_s21 }
  0x18   :  { %v103_v2 = vld [vmem:[#allocation2] sm:$0xff]  ;;  %v145_v3 = vadd.f32 %v142_v1, %v141_v0  ;;  %v104_v4 = vld [vmem:[#allocation2 + $0x8] sm:$0xff]  ;;  %v143_v9 = vld [vmem:[#allocation2 + $0x50] sm:$0xff]  ;;  %s1324_s4 = sshll.u32 %s2158_s2, 4  ;;  %s2159_s22 = smov 512   ;;  %s1325_s4 = int_to_ptr.vmem [resolvable:$true] %s1324_s4 }
  0x19   :  { %v180_v5 = vld [vmem:[#allocation2 + $0x20] sm:$0xff]  ;;  %v181_v6 = vld [vmem:[#allocation2 + $0x28] sm:$0xff]  ;;  %v107_v7 = vadd.f32 %v104_v4, %v103_v2  ;;  %v144_v10 = vld [vmem:[#allocation2 + $0x58] sm:$0xff]  ;;  %s2160_s23 = smov 32  }
  0x1a   :  { %v184_v8 = vadd.f32 %v181_v6, %v180_v5  ;;  %146 = vadd.xlane.f32.xlu1 %v145_v3  ;;  %v105_v11 = vld [vmem:[#allocation2 + $0x40] sm:$0xff]  ;;  %v106_v12 = vld [vmem:[#allocation2 + $0x48] sm:$0xff]  ;;  %v1455_v15 = vld [vmem:[#allocation8 + $0xe0] sm:$0xf]  ;;  %v148_v21 = vadd.f32 %v144_v10, %v143_v9 }
  0x1b   :  { %108 = vadd.xlane.f32.xlu0 %v107_v7  ;;  %v182_v13 = vld [vmem:[#allocation2 + $0x60] sm:$0xff]  ;;  %v183_v14 = vld [vmem:[#allocation2 + $0x68] sm:$0xff]  ;;  %v1583_v18 = vld [vmem:[#allocation8 + $0x1e0] sm:$0xf]  ;;  %v110_v26 = vadd.f32 %v106_v12, %v105_v11 }
  0x1c   :  { %185 = vadd.xlane.f32.xlu2 %v184_v8  ;;  %v1883_v16 = vld [vmem:[#allocation8 + $0xec] sm:$0xf0]  ;;  %v1711_v20 = vld [vmem:[#allocation8 + $0x2e0] sm:$0xf]  ;;  %v187_v27 = vadd.f32 %v183_v14, %v182_v13  ;;  %v222_v38 = vld [vmem:[#allocation2 + $0x78] sm:$0xff] }
  0x1d   :  { %v1456_v17 = vor.u32 %v1883_v16, %v1455_v15  ;;  %v1915_v19 = vld [vmem:[#allocation8 + $0x1ec] sm:$0xf0]  ;;  %v1839_v24 = vld [vmem:[#allocation8 + $0x3e0] sm:$0xf]  ;;  %v220_v45 = vld [vmem:[#allocation2 + $0x38] sm:$0xff] }
  0x1e   :  { %v1584_v22 = vor.u32 %v1915_v19, %v1583_v18  ;;  %v1947_v23 = vld [vmem:[#allocation8 + $0x2ec] sm:$0xf0]  ;;  %v1439_v30 = vld [vmem:[#allocation8 + $0xc0] sm:$0xf] }
  0x1f   :  { %v1979_v25 = vld [vmem:[#allocation8 + $0x3ec] sm:$0xf0]  ;;  %1040 = vmatpush.bf16.msra.mxu0 %v1456_v17  ;;  %v1712_v28 = vor.u32 %v1947_v23, %v1711_v20  ;;  %v1567_v32 = vld [vmem:[#allocation8 + $0x1c0] sm:$0xf] }
  0x20   :  { %v1840_v29 = vor.u32 %v1979_v25, %v1839_v24  ;;  %v1879_v31 = vld [vmem:[#allocation8 + $0xcc] sm:$0xf0]  ;;  %1054 = vmatpush.bf16.msra.mxu1 %v1584_v22  ;;  %v1695_v35 = vld [vmem:[#allocation8 + $0x2c0] sm:$0xf] }
  0x21   :  { %v1440_v33 = vor.u32 %v1879_v31, %v1439_v30  ;;  %v1911_v34 = vld [vmem:[#allocation8 + $0x1cc] sm:$0xf0]  ;;  %v221_v37 = vld [vmem:[#allocation2 + $0x70] sm:$0xff]  ;;  %1068 = vmatpush.bf16.msra.mxu2 %v1712_v28 }
  0x22   :  { %v1943_v36 = vld [vmem:[#allocation8 + $0x2cc] sm:$0xf0]  ;;  %1082 = vmatpush.bf16.msra.mxu3 %v1840_v29  ;;  %v1568_v39 = vor.u32 %v1911_v34, %v1567_v32  ;;  %v1823_v41 = vld [vmem:[#allocation8 + $0x3c0] sm:$0xf]  ;;  %149 = vadd.xlane.f32.xlu1 %v148_v21  ;;  %v226_v63 = vadd.f32 %v222_v38, %v221_v37 }
  0x23   :  { %v1696_v40 = vor.u32 %v1943_v36, %v1695_v35  ;;  %v1975_v42 = vld [vmem:[#allocation8 + $0x3cc] sm:$0xf0]  ;;  %v1423_v43 = vld [vmem:[#allocation8 + $0xa0] sm:$0xf]  ;;  %111 = vadd.xlane.f32.xlu0 %v110_v26  ;;  %1041 = vmatpush.bf16.msra.mxu0 %v1440_v33 }
  0x24   :  { %v219_v44 = vld [vmem:[#allocation2 + $0x30] sm:$0xff]  ;;  %v1824_v46 = vor.u32 %v1975_v42, %v1823_v41  ;;  %v1875_v47 = vld [vmem:[#allocation8 + $0xac] sm:$0xf0]  ;;  %188 = vadd.xlane.f32.xlu2 %v187_v27  ;;  %1055 = vmatpush.bf16.msra.mxu1 %v1568_v39 }
  0x25   :  { %v1551_v48 = vld [vmem:[#allocation8 + $0x1a0] sm:$0xf]  ;;  %v1907_v49 = vld [vmem:[#allocation8 + $0x1ac] sm:$0xf0]  ;;  %v1424_v53 = vor.u32 %v1875_v47, %v1423_v43  ;;  %1069 = vmatpush.bf16.msra.mxu2 %v1696_v40  ;;  %v223_v3 = vadd.f32 %v220_v45, %v219_v44 }
  0x26   :  { %v1679_v50 = vld [vmem:[#allocation8 + $0x2a0] sm:$0xf]  ;;  %v1939_v51 = vld [vmem:[#allocation8 + $0x2ac] sm:$0xf0]  ;;  %v1552_v54 = vor.u32 %v1907_v49, %v1551_v48  ;;  %1083 = vmatpush.bf16.msra.mxu3 %v1824_v46 }
  0x27   :  { %v1807_v52 = vld [vmem:[#allocation8 + $0x3a0] sm:$0xf]  ;;  %v1971_v55 = vld [vmem:[#allocation8 + $0x3ac] sm:$0xf0]  ;;  %v1680_v58 = vor.u32 %v1939_v51, %v1679_v50  ;;  %1042 = vmatpush.bf16.msra.mxu0 %v1424_v53  ;;  %v1457_v53 = vld [vmem:[#allocation8 + $0xf0] sm:$0xf0] }
  0x28   :  { %v1407_v56 = vld [vmem:[#allocation8 + $0x80] sm:$0xf]  ;;  %v1871_v57 = vld [vmem:[#allocation8 + $0x8c] sm:$0xf0]  ;;  %v1808_v59 = vor.u32 %v1971_v55, %v1807_v52  ;;  %1056 = vmatpush.bf16.msra.mxu1 %v1552_v54  ;;  %v1881_v52 = vld [vmem:[#allocation8 + $0xe4] sm:$0xf] }
  0x29   :  { %v1535_v60 = vld [vmem:[#allocation8 + $0x180] sm:$0xf]  ;;  %v1903_v61 = vld [vmem:[#allocation8 + $0x18c] sm:$0xf0]  ;;  %v1408_v4 = vor.u32 %v1871_v57, %v1407_v56  ;;  %1070 = vmatpush.bf16.msra.mxu2 %v1680_v58  ;;  %v1913_v54 = vld [vmem:[#allocation8 + $0x1e4] sm:$0xf] }
  0x2a   :  { %v1663_v62 = vld [vmem:[#allocation8 + $0x280] sm:$0xf]  ;;  %v1935_v0 = vld [vmem:[#allocation8 + $0x28c] sm:$0xf0]  ;;  %v1536_v5 = vor.u32 %v1903_v61, %v1535_v60  ;;  %1084 = vmatpush.bf16.msra.mxu3 %v1808_v59  ;;  %227 = vadd.xlane.f32.xlu1 %v226_v63  ;;  %v1585_v55 = vld [vmem:[#allocation8 + $0x1f0] sm:$0xf0] }
  0x2b   :  { %v1791_v1 = vld [vmem:[#allocation8 + $0x380] sm:$0xf]  ;;  %v1967_v2 = vld [vmem:[#allocation8 + $0x38c] sm:$0xf0]  ;;  %v1664_v8 = vor.u32 %v1935_v0, %v1663_v62  ;;  %224 = vadd.xlane.f32.xlu0 %v223_v3  ;;  %1043 = vmatpush.bf16.msra.mxu0 %v1408_v4  ;;  %v1945_v56 = vld [vmem:[#allocation8 + $0x2e4] sm:$0xf]  ;;  %v1460_v0 = vor.u32 %v1881_v52, %v1457_v53 }
  0x2c   :  { %v1391_v6 = vld [vmem:[#allocation8 + $0x60] sm:$0xf]  ;;  %v1867_v7 = vld [vmem:[#allocation8 + $0x6c] sm:$0xf0]  ;;  %v1792_v9 = vor.u32 %v1967_v2, %v1791_v1  ;;  %1057 = vmatpush.bf16.msra.mxu1 %v1536_v5  ;;  %v1713_v59 = vld [vmem:[#allocation8 + $0x2f0] sm:$0xf0]  ;;  %v1588_v1 = vor.u32 %v1913_v54, %v1585_v55 }
  0x2d   :  { %v1519_v10 = vld [vmem:[#allocation8 + $0x160] sm:$0xf]  ;;  %v1899_v11 = vld [vmem:[#allocation8 + $0x16c] sm:$0xf0]  ;;  %v1392_v16 = vor.u32 %v1867_v7, %v1391_v6  ;;  %1071 = vmatpush.bf16.msra.mxu2 %v1664_v8  ;;  %v1977_v60 = vld [vmem:[#allocation8 + $0x3e4] sm:$0xf]  ;;  %v1716_v4 = vor.u32 %v1945_v56, %v1713_v59 }
  0x2e   :  { %v1647_v12 = vld [vmem:[#allocation8 + $0x260] sm:$0xf]  ;;  %v1931_v13 = vld [vmem:[#allocation8 + $0x26c] sm:$0xf0]  ;;  %v1520_v17 = vor.u32 %v1899_v11, %v1519_v10  ;;  %1085 = vmatpush.bf16.msra.mxu3 %v1792_v9  ;;  %v1841_v61 = vld [vmem:[#allocation8 + $0x3f0] sm:$0xf0] }
  0x2f   :  { %v1775_v14 = vld [vmem:[#allocation8 + $0x360] sm:$0xf]  ;;  %v1963_v15 = vld [vmem:[#allocation8 + $0x36c] sm:$0xf0]  ;;  %v1648_v20 = vor.u32 %v1931_v13, %v1647_v12  ;;  %1044 = vmatpush.bf16.msra.mxu0 %v1392_v16  ;;  %v1877_v2 = vld [vmem:[#allocation8 + $0xc4] sm:$0xf]  ;;  %v1844_v5 = vor.u32 %v1977_v60, %v1841_v61 }
  0x30   :  { %v1375_v18 = vld [vmem:[#allocation8 + $0x40] sm:$0xf]  ;;  %v1863_v19 = vld [vmem:[#allocation8 + $0x4c] sm:$0xf0]  ;;  %v1776_v21 = vor.u32 %v1963_v15, %v1775_v14  ;;  %1058 = vmatpush.bf16.msra.mxu1 %v1520_v17  ;;  %v1441_v3 = vld [vmem:[#allocation8 + $0xd0] sm:$0xf0] }
  0x31   :  { %v1503_v22 = vld [vmem:[#allocation8 + $0x140] sm:$0xf]  ;;  %v1895_v23 = vld [vmem:[#allocation8 + $0x14c] sm:$0xf0]  ;;  %v1376_v28 = vor.u32 %v1863_v19, %v1375_v18  ;;  %1072 = vmatpush.bf16.msra.mxu2 %v1648_v20  ;;  %v1909_v6 = vld [vmem:[#allocation8 + $0x1c4] sm:$0xf]  ;;  %v1444_v12 = vor.u32 %v1877_v2, %v1441_v3 }
  0x32   :  { %v1631_v24 = vld [vmem:[#allocation8 + $0x240] sm:$0xf]  ;;  %v1927_v25 = vld [vmem:[#allocation8 + $0x24c] sm:$0xf0]  ;;  %v1504_v29 = vor.u32 %v1895_v23, %v1503_v22  ;;  %1086 = vmatpush.bf16.msra.mxu3 %v1776_v21  ;;  %v1569_v7 = vld [vmem:[#allocation8 + $0x1d0] sm:$0xf0] }
  0x33   :  { %v1759_v26 = vld [vmem:[#allocation8 + $0x340] sm:$0xf]  ;;  %v1959_v27 = vld [vmem:[#allocation8 + $0x34c] sm:$0xf0]  ;;  %v1632_v32 = vor.u32 %v1927_v25, %v1631_v24  ;;  %1045 = vmatpush.bf16.msra.mxu0 %v1376_v28  ;;  %v1941_v8 = vld [vmem:[#allocation8 + $0x2c4] sm:$0xf]  ;;  %v1572_v13 = vor.u32 %v1909_v6, %v1569_v7 }
  0x34   :  { %v1359_v30 = vld [vmem:[#allocation8 + $0x20] sm:$0xf]  ;;  %v1859_v31 = vld [vmem:[#allocation8 + $0x2c] sm:$0xf0]  ;;  %v1760_v33 = vor.u32 %v1959_v27, %v1759_v26  ;;  %1059 = vmatpush.bf16.msra.mxu1 %v1504_v29  ;;  %v1697_v9 = vld [vmem:[#allocation8 + $0x2d0] sm:$0xf0] }
  0x35   :  { %v1487_v34 = vld [vmem:[#allocation8 + $0x120] sm:$0xf]  ;;  %v1891_v35 = vld [vmem:[#allocation8 + $0x12c] sm:$0xf0]  ;;  %v1360_v41 = vor.u32 %v1859_v31, %v1359_v30  ;;  %1073 = vmatpush.bf16.msra.mxu2 %v1632_v32  ;;  %v1973_v10 = vld [vmem:[#allocation8 + $0x3c4] sm:$0xf]  ;;  %v1700_v14 = vor.u32 %v1941_v8, %v1697_v9 }
  0x36   :  { %v1615_v36 = vld [vmem:[#allocation8 + $0x220] sm:$0xf]  ;;  %v1923_v37 = vld [vmem:[#allocation8 + $0x22c] sm:$0xf0]  ;;  %v1488_v42 = vor.u32 %v1891_v35, %v1487_v34  ;;  %1087 = vmatpush.bf16.msra.mxu3 %v1760_v33  ;;  %v1825_v11 = vld [vmem:[#allocation8 + $0x3d0] sm:$0xf0] }
  0x37   :  { %v1743_v38 = vld [vmem:[#allocation8 + $0x320] sm:$0xf]  ;;  %v1955_v39 = vld [vmem:[#allocation8 + $0x32c] sm:$0xf0]  ;;  %v1616_v46 = vor.u32 %v1923_v37, %v1615_v36  ;;  %1046 = vmatpush.bf16.msra.mxu0 %v1360_v41  ;;  %v1828_v15 = vor.u32 %v1973_v10, %v1825_v11  ;;  %v1873_v16 = vld [vmem:[#allocation8 + $0xa4] sm:$0xf] }
  0x38   :  { %v1343_v40 = vld [vmem:[#allocation8] sm:$0xf]  ;;  %v1855_v43 = vld [vmem:[#allocation8 + $0xc] sm:$0xf0]  ;;  %v1744_v47 = vor.u32 %v1955_v39, %v1743_v38  ;;  %1060 = vmatpush.bf16.msra.mxu1 %v1488_v42  ;;  %v1425_v17 = vld [vmem:[#allocation8 + $0xb0] sm:$0xf0] }
  0x39   :  { %v1471_v44 = vld [vmem:[#allocation8 + $0x100] sm:$0xf]  ;;  %v1887_v45 = vld [vmem:[#allocation8 + $0x10c] sm:$0xf0]  ;;  %v1344_v57 = vor.u32 %v1855_v43, %v1343_v40  ;;  %1074 = vmatpush.bf16.msra.mxu2 %v1616_v46  ;;  %v1905_v18 = vld [vmem:[#allocation8 + $0x1a4] sm:$0xf]  ;;  %v1428_v20 = vor.u32 %v1873_v16, %v1425_v17 }
  0x3a   :  { %v1599_v48 = vld [vmem:[#allocation8 + $0x200] sm:$0xf]  ;;  %v1919_v49 = vld [vmem:[#allocation8 + $0x20c] sm:$0xf0]  ;;  %v1472_v58 = vor.u32 %v1887_v45, %v1471_v44  ;;  %1088 = vmatpush.bf16.msra.mxu3 %v1744_v47  ;;  %v1553_v19 = vld [vmem:[#allocation8 + $0x1b0] sm:$0xf0] }
  0x3b   :  { %v1727_v50 = vld [vmem:[#allocation8 + $0x300] sm:$0xf]  ;;  %v1951_v51 = vld [vmem:[#allocation8 + $0x30c] sm:$0xf0]  ;;  %v1600_v62 = vor.u32 %v1919_v49, %v1599_v48  ;;  %1047 = vmatpush.bf16.msra.mxu0 %v1344_v57  ;;  %v1556_v21 = vor.u32 %v1905_v18, %v1553_v19  ;;  %v1937_v22 = vld [vmem:[#allocation8 + $0x2a4] sm:$0xf] }
  0x3c   :  { %v1728_v63 = vor.u32 %v1951_v51, %v1727_v50  ;;  %1061 = vmatpush.bf16.msra.mxu1 %v1472_v58  ;;  %v1681_v23 = vld [vmem:[#allocation8 + $0x2b0] sm:$0xf0]  ;;  %v1969_v24 = vld [vmem:[#allocation8 + $0x3a4] sm:$0xf] }
  0x3d   :  { %1075 = vmatpush.bf16.msra.mxu2 %v1600_v62  ;;  %v1684_v25 = vor.u32 %v1937_v22, %v1681_v23  ;;  %v1809_v26 = vld [vmem:[#allocation8 + $0x3b0] sm:$0xf0]  ;;  %v1869_v28 = vld [vmem:[#allocation8 + $0x84] sm:$0xf] }
  0x3e   :  { %1089 = vmatpush.bf16.msra.mxu3 %v1728_v63  ;;  %v1812_v27 = vor.u32 %v1969_v24, %v1809_v26  ;;  %v1409_v29 = vld [vmem:[#allocation8 + $0x90] sm:$0xf0]  ;;  %v1901_v30 = vld [vmem:[#allocation8 + $0x184] sm:$0xf] }
  0x3f   :  { %1096 = vmatpush.bf16.msrb.mxu0 %v1460_v0  ;;  %v1412_v31 = vor.u32 %v1869_v28, %v1409_v29  ;;  %v1537_v32 = vld [vmem:[#allocation8 + $0x190] sm:$0xf0]  ;;  %v1933_v33 = vld [vmem:[#allocation8 + $0x284] sm:$0xf] }
  0x40   :  { %1110 = vmatpush.bf16.msrb.mxu1 %v1588_v1  ;;  %v1665_v34 = vld [vmem:[#allocation8 + $0x290] sm:$0xf0]  ;;  %v1540_v35 = vor.u32 %v1901_v30, %v1537_v32  ;;  %v1965_v37 = vld [vmem:[#allocation8 + $0x384] sm:$0xf]  ;;  %v2210_v30 = vld [vmem:[#allocation7] sm:$0xf] }
  0x41   :  { %1124 = vmatpush.bf16.msrb.mxu2 %v1716_v4  ;;  %v1668_v36 = vor.u32 %v1933_v33, %v1665_v34  ;;  %v1793_v38 = vld [vmem:[#allocation8 + $0x390] sm:$0xf0]  ;;  %v1865_v40 = vld [vmem:[#allocation8 + $0x64] sm:$0xf] }
  0x42   :  { %1138 = vmatpush.bf16.msrb.mxu3 %v1844_v5  ;;  %v1796_v39 = vor.u32 %v1965_v37, %v1793_v38  ;;  %v1393_v41 = vld [vmem:[#allocation8 + $0x70] sm:$0xf0]  ;;  %v1897_v42 = vld [vmem:[#allocation8 + $0x164] sm:$0xf] }
  0x43   :  { %1097 = vmatpush.bf16.msrb.mxu0 %v1444_v12  ;;  %v1396_v43 = vor.u32 %v1865_v40, %v1393_v41  ;;  %v1521_v44 = vld [vmem:[#allocation8 + $0x170] sm:$0xf0]  ;;  %v1929_v45 = vld [vmem:[#allocation8 + $0x264] sm:$0xf]  ;;  %v96_v40 = vperm.slane %v2210_v30, 1 }
  0x44   :  { %1111 = vmatpush.bf16.msrb.mxu1 %v1572_v13  ;;  %v1649_v46 = vld [vmem:[#allocation8 + $0x270] sm:$0xf0]  ;;  %v1524_v47 = vor.u32 %v1897_v42, %v1521_v44  ;;  %v1961_v49 = vld [vmem:[#allocation8 + $0x364] sm:$0xf] }
  0x45   :  { %1125 = vmatpush.bf16.msrb.mxu2 %v1700_v14  ;;  %v1652_v48 = vor.u32 %v1929_v45, %v1649_v46  ;;  %v1777_v50 = vld [vmem:[#allocation8 + $0x370] sm:$0xf0]  ;;  %v1861_v52 = vld [vmem:[#allocation8 + $0x44] sm:$0xf]  ;;  %v97_v46 = vperm.slane %v2210_v30, 2 }
  0x46   :  { %1139 = vmatpush.bf16.msrb.mxu3 %v1828_v15  ;;  %v1780_v51 = vor.u32 %v1961_v49, %v1777_v50  ;;  %v1377_v53 = vld [vmem:[#allocation8 + $0x50] sm:$0xf0]  ;;  %v1893_v54 = vld [vmem:[#allocation8 + $0x144] sm:$0xf] }
  0x47   :  { %1098 = vmatpush.bf16.msrb.mxu0 %v1428_v20  ;;  %v1380_v55 = vor.u32 %v1861_v52, %v1377_v53  ;;  %v1505_v56 = vld [vmem:[#allocation8 + $0x150] sm:$0xf0]  ;;  %v1925_v57 = vld [vmem:[#allocation8 + $0x244] sm:$0xf] }
  0x48   :  { %1112 = vmatpush.bf16.msrb.mxu1 %v1556_v21  ;;  %v1633_v58 = vld [vmem:[#allocation8 + $0x250] sm:$0xf0]  ;;  %v1508_v59 = vor.u32 %v1893_v54, %v1505_v56  ;;  %v1957_v61 = vld [vmem:[#allocation8 + $0x344] sm:$0xf] }
  0x49   :  { %1126 = vmatpush.bf16.msrb.mxu2 %v1684_v25  ;;  %v1636_v60 = vor.u32 %v1925_v57, %v1633_v58  ;;  %v1761_v62 = vld [vmem:[#allocation8 + $0x350] sm:$0xf0]  ;;  %v1857_v0 = vld [vmem:[#allocation8 + $0x24] sm:$0xf] }
  0x4a   :  { %1140 = vmatpush.bf16.msrb.mxu3 %v1812_v27  ;;  %v1764_v63 = vor.u32 %v1957_v61, %v1761_v62  ;;  %v1361_v1 = vld [vmem:[#allocation8 + $0x30] sm:$0xf0]  ;;  %v1889_v2 = vld [vmem:[#allocation8 + $0x124] sm:$0xf] }
  0x4b   :  { %1099 = vmatpush.bf16.msrb.mxu0 %v1412_v31  ;;  %v1364_v3 = vor.u32 %v1857_v0, %v1361_v1  ;;  %v1489_v4 = vld [vmem:[#allocation8 + $0x130] sm:$0xf0]  ;;  %v1921_v5 = vld [vmem:[#allocation8 + $0x224] sm:$0xf] }
  0x4c   :  { %1113 = vmatpush.bf16.msrb.mxu1 %v1540_v35  ;;  %v1617_v6 = vld [vmem:[#allocation8 + $0x230] sm:$0xf0]  ;;  %v1492_v7 = vor.u32 %v1889_v2, %v1489_v4  ;;  %v1953_v9 = vld [vmem:[#allocation8 + $0x324] sm:$0xf] }
  0x4d   :  { %1127 = vmatpush.bf16.msrb.mxu2 %v1668_v36  ;;  %v1620_v8 = vor.u32 %v1921_v5, %v1617_v6  ;;  %v1745_v10 = vld [vmem:[#allocation8 + $0x330] sm:$0xf0]  ;;  %v1853_v11 = vld [vmem:[#allocation8 + $0x4] sm:$0xf] }
  0x4e   :  { %1141 = vmatpush.bf16.msrb.mxu3 %v1796_v39  ;;  %v1748_v12 = vor.u32 %v1953_v9, %v1745_v10  ;;  %v1345_v13 = vld [vmem:[#allocation8 + $0x10] sm:$0xf0]  ;;  %v1885_v14 = vld [vmem:[#allocation8 + $0x104] sm:$0xf]  ;;  %v95_v39 = vperm.slane %v2210_v30, 0 }
  0x4f   :  { %1100 = vmatpush.bf16.msrb.mxu0 %v1396_v43  ;;  %v1473_v15 = vld [vmem:[#allocation8 + $0x110] sm:$0xf0]  ;;  %v1348_v16 = vor.u32 %v1853_v11, %v1345_v13  ;;  %v1917_v18 = vld [vmem:[#allocation8 + $0x204] sm:$0xf] }
  0x50   :  { %1114 = vmatpush.bf16.msrb.mxu1 %v1524_v47  ;;  %v1476_v17 = vor.u32 %v1885_v14, %v1473_v15  ;;  %v1601_v19 = vld [vmem:[#allocation8 + $0x210] sm:$0xf0]  ;;  %v1949_v20 = vld [vmem:[#allocation8 + $0x304] sm:$0xf]  ;;  %v98_v47 = vperm.slane %v2210_v30, 3 }
  0x51   :  { %1128 = vmatpush.bf16.msrb.mxu2 %v1652_v48  ;;  %v1604_v21 = vor.u32 %v1917_v18, %v1601_v19  ;;  %v1729_v22 = vld [vmem:[#allocation8 + $0x310] sm:$0xf0] }
  0x52   :  { %1142 = vmatpush.bf16.msrb.mxu3 %v1780_v51  ;;  %v1732_v23 = vor.u32 %v1949_v20, %v1729_v22  ;;  %v2206_v24 = vld [vmem:[#allocation5] ss:$4 sm:$0xf]  ;;  %v154_v25 = vld [vmem:[#allocation5 + $0x1] ss:$4 sm:$0xf] }
  0x53   :  { %1101 = vmatpush.bf16.msrb.mxu0 %v1380_v55  ;;  %v117_v27 = vperm.slane %v2206_v24, 0  ;;  %v118_v28 = vperm.slane %v2206_v24, 1  ;;  %v156_v32 = vperm.slane %v154_v25, 0  ;;  %v157_v33 = vperm.slane %v154_v25, 1 }
  0x54   :  { %1115 = vmatpush.bf16.msrb.mxu1 %v1508_v59  ;;  %v158_v35 = vperm.slane %v154_v25, 2  ;;  %v119_v36 = vperm.slane %v2206_v24, 2  ;;  %v120_v37 = vperm.slane %v2206_v24, 3  ;;  %v193_v38 = vld [vmem:[#allocation5 + $0x2] ss:$4 sm:$0xf] }
  0x55   :  { %1129 = vmatpush.bf16.msrb.mxu2 %v1636_v60  ;;  %v2216_v43 = vld [vmem:[#allocation5 + $0x3] ss:$4 sm:$0xf]  ;;  %v159_v44 = vperm.slane %v154_v25, 3  ;;  %v195_v48 = vperm.slane %v193_v38, 0  ;;  %v196_v49 = vperm.slane %v193_v38, 1 }
  0x56   :  { %1143 = vmatpush.bf16.msrb.mxu3 %v1764_v63  ;;  %v197_v50 = vperm.slane %v193_v38, 2  ;;  %v198_v54 = vperm.slane %v193_v38, 3  ;;  %v234_v55 = vperm.slane %v2216_v43, 0  ;;  %v235_v59 = vperm.slane %v2216_v43, 1 }
  0x57   :  { %1102 = vmatpush.bf16.msrb.mxu0 %v1364_v3  ;;  %v236_v60 = vperm.slane %v2216_v43, 2  ;;  %v237_v2 = vperm.slane %v2216_v43, 3 }
  0x58   :  { %1116 = vmatpush.bf16.msrb.mxu1 %v1492_v7 }
  0x59   :  { %1130 = vmatpush.bf16.msrb.mxu2 %v1620_v8 }
  0x5a   :  { %1144 = vmatpush.bf16.msrb.mxu3 %v1748_v12 }
  0x5b   :  { %1103 = vmatpush.bf16.msrb.mxu0 %v1348_v16 }
  0x5c   :  { %1117 = vmatpush.bf16.msrb.mxu1 %v1476_v17 }
  0x5d   :  { %1131 = vmatpush.bf16.msrb.mxu2 %v1604_v21 }
  0x5e   :  { %1145 = vmatpush.bf16.msrb.mxu3 %v1732_v23 }
  0x8d   :  { %v147_v26 = vpop.xlane.xlu1 %146 }
  0x8e   :  { %v109_v29 = vpop.xlane.xlu0 %108  ;;  %v151_v45 = vmul.f32 0.00390625, %v147_v26 }
  0x8f   :  { %v186_v31 = vpop.xlane.xlu2 %185  ;;  %v113_v34 = vmul.f32 0.00390625, %v109_v29 }
  0x90   :  { %v190_v51 = vmul.f32 0.00390625, %v186_v31  ;;  %v164_v61 = vmul.f32 %v156_v32, %v151_v45  ;;  %v165_v62 = vmul.f32 %v157_v33, %v151_v45  ;;  %v166_v3 = vmul.f32 %v158_v35, %v151_v45 }
  0x91   :  { %v125_v41 = vmul.f32 %v117_v27, %v113_v34  ;;  %v126_v42 = vmul.f32 %v118_v28, %v113_v34  ;;  %v127_v52 = vmul.f32 %v119_v36, %v113_v34  ;;  %v128_v53 = vmul.f32 %v120_v37, %v113_v34 }
  0x92   :  { %v167_v4 = vmul.f32 %v159_v44, %v151_v45  ;;  %v203_v5 = vmul.f32 %v195_v48, %v190_v51  ;;  %v204_v6 = vmul.f32 %v196_v49, %v190_v51  ;;  %v205_v9 = vmul.f32 %v197_v50, %v190_v51 }
  0x93   :  { %v133_v56 = vadd.f32 %v125_v41, %v95_v39  ;;  %v134_v57 = vadd.f32 %v126_v42, %v96_v40  ;;  %v135_v7 = vadd.f32 %v127_v52, %v97_v46  ;;  %v136_v8 = vadd.f32 %v128_v53, %v98_v47 }
  0x94   :  { %v206_v10 = vmul.f32 %v198_v54, %v190_v51 }
  0x95   :  { %v150_v58 = vpop.xlane.xlu1 %149  ;;  %v172_v11 = vadd.f32 %v164_v61, %v133_v56  ;;  %v173_v12 = vadd.f32 %v165_v62, %v134_v57  ;;  %v174_v41 = vadd.f32 %v166_v3, %v135_v7  ;;  %v175_v42 = vadd.f32 %v167_v4, %v136_v8  ;;  %v1463_v61 = vld [vmem:[#allocation8 + $0xe8] sm:$0xf]  ;;  %v1884_v3 = vld [vmem:[#allocation8 + $0xf4] sm:$0xf0] }
  0x96   :  { %v152_v63 = vmul.f32 0.00390625, %v150_v58  ;;  %v112_v0 = vpop.xlane.xlu0 %111  ;;  %v1591_v4 = vld [vmem:[#allocation8 + $0x1e8] sm:$0xf] }
  0x97   :  { %v189_v1 = vpop.xlane.xlu2 %188  ;;  %v114_v13 = vmul.f32 0.00390625, %v112_v0  ;;  %v211_v45 = vadd.f32 %v203_v5, %v172_v11  ;;  %v213_v51 = vadd.f32 %v205_v9, %v174_v41  ;;  %v214_v52 = vadd.f32 %v206_v10, %v175_v42  ;;  %v1916_v5 = vld [vmem:[#allocation8 + $0x1f4] sm:$0xf0]  ;;  %v1687_v42 = vld [vmem:[#allocation8 + $0x2a8] sm:$0xf] }
  0x98   :  { %v191_v14 = vmul.f32 0.00390625, %v189_v1  ;;  %v168_v15 = vmul.f32 %v156_v32, %v152_v63  ;;  %v169_v16 = vmul.f32 %v157_v33, %v152_v63  ;;  %v170_v17 = vmul.f32 %v158_v35, %v152_v63  ;;  %v1948_v11 = vld [vmem:[#allocation8 + $0x2f4] sm:$0xf0] }
  0x99   :  { %v171_v18 = vmul.f32 %v159_v44, %v152_v63  ;;  %v129_v19 = vmul.f32 %v117_v27, %v114_v13  ;;  %v130_v20 = vmul.f32 %v118_v28, %v114_v13  ;;  %v131_v21 = vmul.f32 %v119_v36, %v114_v13  ;;  %v1908_v41 = vld [vmem:[#allocation8 + $0x1b4] sm:$0xf0] }
  0x9a   :  { %v132_v22 = vmul.f32 %v120_v37, %v114_v13  ;;  %v207_v23 = vmul.f32 %v195_v48, %v191_v14  ;;  %v208_v24 = vmul.f32 %v196_v49, %v191_v14  ;;  %v209_v25 = vmul.f32 %v197_v50, %v191_v14  ;;  %v1980_v13 = vld [vmem:[#allocation8 + $0x3f4] sm:$0xf0] }
  0x9b   :  { %v210_v26 = vmul.f32 %v198_v54, %v191_v14  ;;  %v137_v29 = vadd.f32 %v129_v19, %v95_v39  ;;  %v138_v30 = vadd.f32 %v130_v20, %v96_v40  ;;  %v139_v31 = vadd.f32 %v131_v21, %v97_v46  ;;  %v1575_v19 = vld [vmem:[#allocation8 + $0x1c8] sm:$0xf]  ;;  %v1912_v20 = vld [vmem:[#allocation8 + $0x1d4] sm:$0xf0] }
  0x9c   :  { %v140_v34 = vadd.f32 %v132_v22, %v98_v47  ;;  %v212_v50 = vadd.f32 %v204_v6, %v173_v12  ;;  %v1719_v6 = vld [vmem:[#allocation8 + $0x2e8] sm:$0xf]  ;;  %v1464_v14 = vor.u32 %v1884_v3, %v1463_v61  ;;  %v1944_v22 = vld [vmem:[#allocation8 + $0x2d4] sm:$0xf0] }
  0x9d   :  { %v228_v38 = vpop.xlane.xlu1 %227  ;;  %v176_v33 = vadd.f32 %v168_v15, %v137_v29  ;;  %v177_v35 = vadd.f32 %v169_v16, %v138_v30  ;;  %v178_v44 = vadd.f32 %v170_v17, %v139_v31  ;;  %v1847_v12 = vld [vmem:[#allocation8 + $0x3e8] sm:$0xf]  ;;  %v1880_v16 = vld [vmem:[#allocation8 + $0xd4] sm:$0xf0]  ;;  %v1720_v17 = vor.u32 %v1948_v11, %v1719_v6 }
  0x9e   :  { %v230_v32 = vmul.f32 0.00390625, %v228_v38  ;;  %v179_v27 = vadd.f32 %v171_v18, %v140_v34  ;;  %v225_v28 = vpop.xlane.xlu0 %224  ;;  %v1848_v18 = vor.u32 %v1980_v13, %v1847_v12  ;;  %v1703_v21 = vld [vmem:[#allocation8 + $0x2c8] sm:$0xf]  ;;  %v1876_v30 = vld [vmem:[#allocation8 + $0xb4] sm:$0xf0] }
  0x9f   :  { %v215_v46 = vadd.f32 %v207_v23, %v176_v33  ;;  %v216_v47 = vadd.f32 %v208_v24, %v177_v35  ;;  %v217_v48 = vadd.f32 %v209_v25, %v178_v44  ;;  %v229_v53 = vmul.f32 0.00390625, %v225_v28  ;;  %v1831_v23 = vld [vmem:[#allocation8 + $0x3c8] sm:$0xf]  ;;  %v1976_v24 = vld [vmem:[#allocation8 + $0x3d4] sm:$0xf0] }
  0xa0   :  { %v246_v36 = vmul.f32 %v234_v55, %v230_v32  ;;  %v247_v37 = vmul.f32 %v235_v59, %v230_v32  ;;  %v248_v39 = vmul.f32 %v236_v60, %v230_v32  ;;  %v249_v40 = vmul.f32 %v237_v2, %v230_v32  ;;  %v1431_v29 = vld [vmem:[#allocation8 + $0xa8] sm:$0xf]  ;;  %v1972_v33 = vld [vmem:[#allocation8 + $0x3b4] sm:$0xf0] }
  0xa1   :  { %v218_v49 = vadd.f32 %v210_v26, %v179_v27  ;;  %v242_v62 = vmul.f32 %v234_v55, %v229_v53  ;;  %v243_v63 = vmul.f32 %v235_v59, %v229_v53  ;;  %v244_v0 = vmul.f32 %v236_v60, %v229_v53  ;;  %v1559_v38 = vld [vmem:[#allocation8 + $0x1a8] sm:$0xf]  ;;  %v1872_v28 = vld [vmem:[#allocation8 + $0x94] sm:$0xf0] }
  0xa2   :  { %v254_v54 = vadd.f32 %v246_v36, %v215_v46  ;;  %v255_v56 = vadd.f32 %v247_v37, %v216_v47  ;;  %v256_v57 = vadd.f32 %v248_v39, %v217_v48  ;;  %v245_v1 = vmul.f32 %v237_v2, %v229_v53  ;;  %v1447_v2 = vld [vmem:[#allocation8 + $0xc8] sm:$0xf]  ;;  %v1936_v47 = vld [vmem:[#allocation8 + $0x294] sm:$0xf0] }
  0xa3   :  { %v257_v58 = vadd.f32 %v249_v40, %v218_v49  ;;  %v250_v7 = vadd.f32 %v242_v62, %v211_v45  ;;  %v251_v8 = vadd.f32 %v243_v63, %v212_v50  ;;  %v252_v9 = vadd.f32 %v244_v0, %v213_v51  ;;  %v1940_v45 = vld [vmem:[#allocation8 + $0x2b4] sm:$0xf0]  ;;  %v1815_v32 = vld [vmem:[#allocation8 + $0x3a8] sm:$0xf] }
  0xa4   :  { %v253_v10 = vadd.f32 %v245_v1, %v214_v52  ;;  %v1592_v55 = vor.u32 %v1916_v5, %v1591_v4  ;;  %v1448_v25 = vor.u32 %v1880_v16, %v1447_v2  ;;  %v1576_v26 = vor.u32 %v1912_v20, %v1575_v19  ;;  %v1415_v27 = vld [vmem:[#allocation8 + $0x88] sm:$0xf]  ;;  %v1904_v40 = vld [vmem:[#allocation8 + $0x194] sm:$0xf0] }
  0xa5   :  { %v2236_v15 = vpack.c.bf16 %v254_v54, %v250_v7  ;;  %v2238_v59 = vpack.c.bf16 %v255_v56, %v251_v8  ;;  %v2240_v43 = vpack.c.bf16 %v256_v57, %v252_v9  ;;  %v1704_v31 = vor.u32 %v1944_v22, %v1703_v21  ;;  %v1543_v39 = vld [vmem:[#allocation8 + $0x188] sm:$0xf]  ;;  %v1968_v49 = vld [vmem:[#allocation8 + $0x394] sm:$0xf0] }
  0xa6   :  { %v2242_v60 = vpack.c.bf16 %v257_v58, %v253_v10  ;;  %v1832_v34 = vor.u32 %v1976_v24, %v1831_v23  ;;  %v1432_v35 = vor.u32 %v1876_v30, %v1431_v29  ;;  %v1560_v44 = vor.u32 %v1908_v41, %v1559_v38  ;;  %v1671_v46 = vld [vmem:[#allocation8 + $0x288] sm:$0xf]  ;;  %v1868_v53 = vld [vmem:[#allocation8 + $0x74] sm:$0xf0] }
  0xa7   :  { %1048 = vmatmul.bf16.vlgmr.msra.gmra.mxu0 %v2236_v15  ;;  %1062 = vmatmul.bf16.vlgmr.msra.gmra.mxu1 %v2238_v59  ;;  %v1688_v36 = vor.u32 %v1940_v45, %v1687_v42  ;;  %v1816_v37 = vor.u32 %v1972_v33, %v1815_v32  ;;  %v1799_v48 = vld [vmem:[#allocation8 + $0x388] sm:$0xf]  ;;  %v1416_v50 = vor.u32 %v1872_v28, %v1415_v27  ;;  %v1900_v58 = vld [vmem:[#allocation8 + $0x174] sm:$0xf0]  ;;  %v1914_v27 = vld [vmem:[#allocation8 + $0x1ec] sm:$0xf] }
  0xa8   :  { %1076 = vmatmul.bf16.vlgmr.msra.gmra.mxu2 %v2240_v43  ;;  %1090 = vmatmul.bf16.vlgmr.msra.gmra.mxu3 %v2242_v60  ;;  %v1544_v51 = vor.u32 %v1904_v40, %v1543_v39  ;;  %v1399_v52 = vld [vmem:[#allocation8 + $0x68] sm:$0xf]  ;;  %v1672_v54 = vor.u32 %v1936_v47, %v1671_v46  ;;  %v1800_v56 = vor.u32 %v1968_v49, %v1799_v48  ;;  %v1932_v62 = vld [vmem:[#allocation8 + $0x274] sm:$0xf0]  ;;  %v1593_v28 = vld [vmem:[#allocation8 + $0x1f8] sm:$0xf0] }
  0xa9   :  { %1152 = vmatpush.bf16.msra.mxu0 %v1464_v14  ;;  %1166 = vmatpush.bf16.msra.mxu1 %v1592_v55  ;;  %v1527_v57 = vld [vmem:[#allocation8 + $0x168] sm:$0xf]  ;;  %v1964_v0 = vld [vmem:[#allocation8 + $0x374] sm:$0xf0]  ;;  %v1400_v1 = vor.u32 %v1868_v53, %v1399_v52  ;;  %v1721_v40 = vld [vmem:[#allocation8 + $0x2f8] sm:$0xf0] }
  0xaa   :  { %1180 = vmatpush.bf16.msra.mxu2 %v1720_v17  ;;  %1194 = vmatpush.bf16.msra.mxu3 %v1848_v18  ;;  %v1655_v61 = vld [vmem:[#allocation8 + $0x268] sm:$0xf]  ;;  %v1528_v3 = vor.u32 %v1900_v58, %v1527_v57  ;;  %v1864_v5 = vld [vmem:[#allocation8 + $0x54] sm:$0xf0]  ;;  %v1978_v46 = vld [vmem:[#allocation8 + $0x3ec] sm:$0xf] }
  0xab   :  { %v1783_v63 = vld [vmem:[#allocation8 + $0x368] sm:$0xf]  ;;  %v1656_v6 = vor.u32 %v1932_v62, %v1655_v61  ;;  %v1896_v9 = vld [vmem:[#allocation8 + $0x154] sm:$0xf0]  ;;  %v1849_v47 = vld [vmem:[#allocation8 + $0x3f8] sm:$0xf0] }
  0xac   :  { %v1383_v4 = vld [vmem:[#allocation8 + $0x48] sm:$0xf]  ;;  %v1784_v7 = vor.u32 %v1964_v0, %v1783_v63  ;;  %v1928_v11 = vld [vmem:[#allocation8 + $0x254] sm:$0xf0]  ;;  %v1878_v52 = vld [vmem:[#allocation8 + $0xcc] sm:$0xf] }
  0xad   :  { %1153 = vmatpush.bf16.msra.mxu0 %v1448_v25  ;;  %1167 = vmatpush.bf16.msra.mxu1 %v1576_v26  ;;  %v1511_v8 = vld [vmem:[#allocation8 + $0x148] sm:$0xf]  ;;  %v1960_v13 = vld [vmem:[#allocation8 + $0x354] sm:$0xf0]  ;;  %v1384_v14 = vor.u32 %v1864_v5, %v1383_v4  ;;  %v1449_v53 = vld [vmem:[#allocation8 + $0xd8] sm:$0xf0] }
  0xae   :  { %1181 = vmatpush.bf16.msra.mxu2 %v1704_v31  ;;  %1195 = vmatpush.bf16.msra.mxu3 %v1832_v34  ;;  %v1639_v10 = vld [vmem:[#allocation8 + $0x248] sm:$0xf]  ;;  %v1512_v55 = vor.u32 %v1896_v9, %v1511_v8  ;;  %v1860_v16 = vld [vmem:[#allocation8 + $0x34] sm:$0xf0]  ;;  %v1910_v57 = vld [vmem:[#allocation8 + $0x1cc] sm:$0xf] }
  0xaf   :  { %v1767_v12 = vld [vmem:[#allocation8 + $0x348] sm:$0xf]  ;;  %v1640_v17 = vor.u32 %v1928_v11, %v1639_v10  ;;  %v1892_v20 = vld [vmem:[#allocation8 + $0x134] sm:$0xf0]  ;;  %v1577_v58 = vld [vmem:[#allocation8 + $0x1d8] sm:$0xf0] }
  0xb0   :  { %v1367_v2 = vld [vmem:[#allocation8 + $0x28] sm:$0xf]  ;;  %v1768_v18 = vor.u32 %v1960_v13, %v1767_v12  ;;  %v1924_v22 = vld [vmem:[#allocation8 + $0x234] sm:$0xf0]  ;;  %v1942_v61 = vld [vmem:[#allocation8 + $0x2cc] sm:$0xf] }
  0xb1   :  { %1154 = vmatpush.bf16.msra.mxu0 %v1432_v35  ;;  %1168 = vmatpush.bf16.msra.mxu1 %v1560_v44  ;;  %v1495_v19 = vld [vmem:[#allocation8 + $0x128] sm:$0xf]  ;;  %v1956_v24 = vld [vmem:[#allocation8 + $0x334] sm:$0xf0]  ;;  %v1368_v26 = vor.u32 %v1860_v16, %v1367_v2  ;;  %v1882_v35 = vld [vmem:[#allocation8 + $0xec] sm:$0xf] }
  0xb2   :  { %1182 = vmatpush.bf16.msra.mxu2 %v1688_v36  ;;  %1196 = vmatpush.bf16.msra.mxu3 %v1816_v37  ;;  %v1623_v21 = vld [vmem:[#allocation8 + $0x228] sm:$0xf]  ;;  %v1496_v29 = vor.u32 %v1892_v20, %v1495_v19  ;;  %v1856_v30 = vld [vmem:[#allocation8 + $0x14] sm:$0xf0]  ;;  %v1465_v44 = vld [vmem:[#allocation8 + $0xf8] sm:$0xf0] }
  0xb3   :  { %v1751_v23 = vld [vmem:[#allocation8 + $0x328] sm:$0xf]  ;;  %v1888_v34 = vld [vmem:[#allocation8 + $0x114] sm:$0xf0]  ;;  %v1624_v38 = vor.u32 %v1924_v22, %v1623_v21  ;;  %v1946_v36 = vld [vmem:[#allocation8 + $0x2ec] sm:$0xf] }
  0xb4   :  { %v1351_v25 = vld [vmem:[#allocation8 + $0x8] sm:$0xf]  ;;  %v1752_v41 = vor.u32 %v1956_v24, %v1751_v23  ;;  %v1920_v45 = vld [vmem:[#allocation8 + $0x214] sm:$0xf0]  ;;  %v1705_v62 = vld [vmem:[#allocation8 + $0x2d8] sm:$0xf0] }
  0xb5   :  { %1155 = vmatpush.bf16.msra.mxu0 %v1416_v50  ;;  %1169 = vmatpush.bf16.msra.mxu1 %v1544_v51  ;;  %v1479_v31 = vld [vmem:[#allocation8 + $0x108] sm:$0xf]  ;;  %v1952_v33 = vld [vmem:[#allocation8 + $0x314] sm:$0xf0]  ;;  %v1352_v37 = vor.u32 %v1856_v30, %v1351_v25  ;;  %v1468_v50 = vor.u32 %v1882_v35, %v1465_v44  ;;  %v1596_v51 = vor.u32 %v1914_v27, %v1593_v28  ;;  %v1974_v63 = vld [vmem:[#allocation8 + $0x3cc] sm:$0xf] }
  0xb6   :  { %1183 = vmatpush.bf16.msra.mxu2 %v1672_v54  ;;  %1197 = vmatpush.bf16.msra.mxu3 %v1800_v56  ;;  %v1607_v42 = vld [vmem:[#allocation8 + $0x208] sm:$0xf]  ;;  %v1480_v39 = vor.u32 %v1888_v34, %v1479_v31  ;;  %v1724_v54 = vor.u32 %v1946_v36, %v1721_v40  ;;  %v1852_v56 = vor.u32 %v1978_v46, %v1849_v47  ;;  %v1833_v0 = vld [vmem:[#allocation8 + $0x3d8] sm:$0xf0]  ;;  %v1874_v4 = vld [vmem:[#allocation8 + $0xac] sm:$0xf] }
  0xb7   :  { %1104 = vmatmul.bf16.vlgmr.msrb.gmra.mxu0 %v2236_v15  ;;  %1118 = vmatmul.bf16.vlgmr.msrb.gmra.mxu1 %v2238_v59  ;;  %v1735_v32 = vld [vmem:[#allocation8 + $0x308] sm:$0xf]  ;;  %v1608_v48 = vor.u32 %v1920_v45, %v1607_v42  ;;  %v1433_v5 = vld [vmem:[#allocation8 + $0xb8] sm:$0xf0]  ;;  %v1906_v8 = vld [vmem:[#allocation8 + $0x1ac] sm:$0xf] }
  0xb8   :  { %1132 = vmatmul.bf16.vlgmr.msrb.gmra.mxu2 %v2240_v43  ;;  %1146 = vmatmul.bf16.vlgmr.msrb.gmra.mxu3 %v2242_v60  ;;  %v1736_v49 = vor.u32 %v1952_v33, %v1735_v32  ;;  %v1561_v9 = vld [vmem:[#allocation8 + $0x1b8] sm:$0xf0]  ;;  %v1938_v10 = vld [vmem:[#allocation8 + $0x2ac] sm:$0xf] }
  0xb9   :  { %1156 = vmatpush.bf16.msra.mxu0 %v1400_v1  ;;  %1170 = vmatpush.bf16.msra.mxu1 %v1528_v3  ;;  %v1452_v1 = vor.u32 %v1878_v52, %v1449_v53  ;;  %v1580_v3 = vor.u32 %v1910_v57, %v1577_v58  ;;  %v1689_v11 = vld [vmem:[#allocation8 + $0x2b8] sm:$0xf0]  ;;  %v1970_v12 = vld [vmem:[#allocation8 + $0x3ac] sm:$0xf] }
  0xba   :  { %1184 = vmatpush.bf16.msra.mxu2 %v1656_v6  ;;  %1198 = vmatpush.bf16.msra.mxu3 %v1784_v7  ;;  %v1708_v6 = vor.u32 %v1942_v61, %v1705_v62  ;;  %v1836_v7 = vor.u32 %v1974_v63, %v1833_v0  ;;  %v1817_v13 = vld [vmem:[#allocation8 + $0x3b8] sm:$0xf0]  ;;  %v1870_v2 = vld [vmem:[#allocation8 + $0x8c] sm:$0xf] }
  0xbb   :  { %v1417_v16 = vld [vmem:[#allocation8 + $0x98] sm:$0xf0]  ;;  %v1902_v19 = vld [vmem:[#allocation8 + $0x18c] sm:$0xf] }
  0xbc   :  { %v1545_v20 = vld [vmem:[#allocation8 + $0x198] sm:$0xf0]  ;;  %v1934_v21 = vld [vmem:[#allocation8 + $0x28c] sm:$0xf]  ;;  %v1420_v25 = vor.u32 %v1870_v2, %v1417_v16 }
  0xbd   :  { %1157 = vmatpush.bf16.msra.mxu0 %v1384_v14  ;;  %1171 = vmatpush.bf16.msra.mxu1 %v1512_v55  ;;  %v1436_v14 = vor.u32 %v1874_v4, %v1433_v5  ;;  %v1564_v55 = vor.u32 %v1906_v8, %v1561_v9  ;;  %v1673_v22 = vld [vmem:[#allocation8 + $0x298] sm:$0xf0]  ;;  %v1966_v23 = vld [vmem:[#allocation8 + $0x38c] sm:$0xf] }
  0xbe   :  { %1185 = vmatpush.bf16.msra.mxu2 %v1640_v17  ;;  %1199 = vmatpush.bf16.msra.mxu3 %v1768_v18  ;;  %v1692_v17 = vor.u32 %v1938_v10, %v1689_v11  ;;  %v1820_v18 = vor.u32 %v1970_v12, %v1817_v13  ;;  %v1801_v24 = vld [vmem:[#allocation8 + $0x398] sm:$0xf0]  ;;  %v1676_v31 = vor.u32 %v1934_v21, %v1673_v22  ;;  %v1930_v42 = vld [vmem:[#allocation8 + $0x26c] sm:$0xf] }
  0xbf   :  { %v1401_v30 = vld [vmem:[#allocation8 + $0x78] sm:$0xf0]  ;;  %v1804_v34 = vor.u32 %v1966_v23, %v1801_v24  ;;  %v1962_v32 = vld [vmem:[#allocation8 + $0x36c] sm:$0xf] }
  0xc0   :  { %v1657_v45 = vld [vmem:[#allocation8 + $0x278] sm:$0xf0]  ;;  %v1862_v27 = vld [vmem:[#allocation8 + $0x4c] sm:$0xf] }
  0xc1   :  { %1158 = vmatpush.bf16.msra.mxu0 %v1368_v26  ;;  %1172 = vmatpush.bf16.msra.mxu1 %v1496_v29  ;;  %v1548_v26 = vor.u32 %v1902_v19, %v1545_v20  ;;  %v1866_v29 = vld [vmem:[#allocation8 + $0x6c] sm:$0xf]  ;;  %v1785_v33 = vld [vmem:[#allocation8 + $0x378] sm:$0xf0]  ;;  %v1660_v36 = vor.u32 %v1930_v42, %v1657_v45 }
  0xc2   :  { %1186 = vmatpush.bf16.msra.mxu2 %v1624_v38  ;;  %1200 = vmatpush.bf16.msra.mxu3 %v1752_v41  ;;  %v1898_v38 = vld [vmem:[#allocation8 + $0x16c] sm:$0xf]  ;;  %v1529_v41 = vld [vmem:[#allocation8 + $0x178] sm:$0xf0]  ;;  %v1404_v35 = vor.u32 %v1866_v29, %v1401_v30 }
  0xc3   :  { %v1532_v44 = vor.u32 %v1898_v38, %v1529_v41  ;;  %v1385_v28 = vld [vmem:[#allocation8 + $0x58] sm:$0xf0]  ;;  %v1926_v46 = vld [vmem:[#allocation8 + $0x24c] sm:$0xf]  ;;  %v390_v41 = vld [vmem:[#allocation10] sm:$0xf] }
  0xc4   :  { %v1513_v40 = vld [vmem:[#allocation8 + $0x158] sm:$0xf0]  ;;  %v1858_v52 = vld [vmem:[#allocation8 + $0x2c] sm:$0xf]  ;;  %v392_v42 = vperm.slane %v390_v41, 0 }
  0xc5   :  { %1159 = vmatpush.bf16.msra.mxu0 %v1352_v37  ;;  %1173 = vmatpush.bf16.msra.mxu1 %v1480_v39  ;;  %v1788_v37 = vor.u32 %v1962_v32, %v1785_v33  ;;  %v1894_v39 = vld [vmem:[#allocation8 + $0x14c] sm:$0xf]  ;;  %v1641_v47 = vld [vmem:[#allocation8 + $0x258] sm:$0xf0]  ;;  %v394_v33 = vperm.slane %v390_v41, 2 }
  0xc6   :  { %1187 = vmatpush.bf16.msra.mxu2 %v1608_v48  ;;  %1201 = vmatpush.bf16.msra.mxu3 %v1736_v49  ;;  %v1958_v48 = vld [vmem:[#allocation8 + $0x34c] sm:$0xf]  ;;  %v1769_v49 = vld [vmem:[#allocation8 + $0x358] sm:$0xf0] }
  0xc7   :  { %v1369_v53 = vld [vmem:[#allocation8 + $0x38] sm:$0xf0]  ;;  %v1890_v57 = vld [vmem:[#allocation8 + $0x12c] sm:$0xf] }
  0xc8   :  { %1160 = vmatmul.bf16.vlgmr.msra.gmra.mxu0 %v2236_v15  ;;  %1174 = vmatmul.bf16.vlgmr.msra.gmra.mxu1 %v2238_v59  ;;  %v1497_v58 = vld [vmem:[#allocation8 + $0x138] sm:$0xf0]  ;;  %v1922_v61 = vld [vmem:[#allocation8 + $0x22c] sm:$0xf] }
  0xc9   :  { %1208 = vmatpush.bf16.msrb.mxu0 %v1468_v50  ;;  %1222 = vmatpush.bf16.msrb.mxu1 %v1596_v51  ;;  %v1388_v50 = vor.u32 %v1862_v27, %v1385_v28  ;;  %v1516_v51 = vor.u32 %v1894_v39, %v1513_v40  ;;  %v1625_v62 = vld [vmem:[#allocation8 + $0x238] sm:$0xf0]  ;;  %v1954_v63 = vld [vmem:[#allocation8 + $0x32c] sm:$0xf] }
  0xca   :  { %1236 = vmatpush.bf16.msrb.mxu2 %v1724_v54  ;;  %1250 = vmatpush.bf16.msrb.mxu3 %v1852_v56  ;;  %v1644_v54 = vor.u32 %v1926_v46, %v1641_v47  ;;  %v1772_v56 = vor.u32 %v1958_v48, %v1769_v49  ;;  %v1753_v0 = vld [vmem:[#allocation8 + $0x338] sm:$0xf0]  ;;  %v1854_v4 = vld [vmem:[#allocation8 + $0xc] sm:$0xf]  ;;  %v395_v47 = vperm.slane %v390_v41, 3 }
  0xcb   :  { %1188 = vmatmul.bf16.vlgmr.msra.gmra.mxu2 %v2240_v43  ;;  %1202 = vmatmul.bf16.vlgmr.msra.gmra.mxu3 %v2242_v60  ;;  %v1353_v5 = vld [vmem:[#allocation8 + $0x18] sm:$0xf0]  ;;  %v1886_v8 = vld [vmem:[#allocation8 + $0x10c] sm:$0xf] }
  0xcc   :  { %v1481_v9 = vld [vmem:[#allocation8 + $0x118] sm:$0xf0]  ;;  %v1918_v10 = vld [vmem:[#allocation8 + $0x20c] sm:$0xf] }
  0xcd   :  { %1209 = vmatpush.bf16.msrb.mxu0 %v1452_v1  ;;  %1223 = vmatpush.bf16.msrb.mxu1 %v1580_v3  ;;  %v1372_v1 = vor.u32 %v1858_v52, %v1369_v53  ;;  %v1500_v3 = vor.u32 %v1890_v57, %v1497_v58  ;;  %v1609_v11 = vld [vmem:[#allocation8 + $0x218] sm:$0xf0]  ;;  %v1950_v12 = vld [vmem:[#allocation8 + $0x30c] sm:$0xf] }
  0xce   :  { %1237 = vmatpush.bf16.msrb.mxu2 %v1708_v6  ;;  %1251 = vmatpush.bf16.msrb.mxu3 %v1836_v7  ;;  %v1628_v6 = vor.u32 %v1922_v61, %v1625_v62  ;;  %v1756_v7 = vor.u32 %v1954_v63, %v1753_v0  ;;  %v1737_v13 = vld [vmem:[#allocation8 + $0x318] sm:$0xf0]  ;;  %v1612_v2 = vor.u32 %v1918_v10, %v1609_v11 }
  0xcf   :  { %v1740_v16 = vor.u32 %v1950_v12, %v1737_v13 }
  0xd1   :  { %1210 = vmatpush.bf16.msrb.mxu0 %v1436_v14  ;;  %1224 = vmatpush.bf16.msrb.mxu1 %v1564_v55  ;;  %v1356_v14 = vor.u32 %v1854_v4, %v1353_v5  ;;  %v1484_v55 = vor.u32 %v1886_v8, %v1481_v9 }
  0xd2   :  { %1238 = vmatpush.bf16.msrb.mxu2 %v1692_v17  ;;  %1252 = vmatpush.bf16.msrb.mxu3 %v1820_v18 }
  0xd5   :  { %1211 = vmatpush.bf16.msrb.mxu0 %v1420_v25  ;;  %1225 = vmatpush.bf16.msrb.mxu1 %v1548_v26 }
  0xd6   :  { %1239 = vmatpush.bf16.msrb.mxu2 %v1676_v31  ;;  %1253 = vmatpush.bf16.msrb.mxu3 %v1804_v34 }
  0xd9   :  { %1212 = vmatpush.bf16.msrb.mxu0 %v1404_v35  ;;  %1226 = vmatpush.bf16.msrb.mxu1 %v1532_v44 }
  0xda   :  { %1240 = vmatpush.bf16.msrb.mxu2 %v1660_v36  ;;  %1254 = vmatpush.bf16.msrb.mxu3 %v1788_v37 }
  0xdd   :  { %1213 = vmatpush.bf16.msrb.mxu0 %v1388_v50  ;;  %1227 = vmatpush.bf16.msrb.mxu1 %v1516_v51 }
  0xde   :  { %1241 = vmatpush.bf16.msrb.mxu2 %v1644_v54  ;;  %1255 = vmatpush.bf16.msrb.mxu3 %v1772_v56 }
  0xe1   :  { %1214 = vmatpush.bf16.msrb.mxu0 %v1372_v1  ;;  %1228 = vmatpush.bf16.msrb.mxu1 %v1500_v3 }
  0xe2   :  { %1242 = vmatpush.bf16.msrb.mxu2 %v1628_v6  ;;  %1256 = vmatpush.bf16.msrb.mxu3 %v1756_v7 }
  0xe5   :  { %1215 = vmatpush.bf16.msrb.mxu0 %v1356_v14  ;;  %1229 = vmatpush.bf16.msrb.mxu1 %v1484_v55 }
  0xe6   :  { %1243 = vmatpush.bf16.msrb.mxu2 %v1612_v2  ;;  %1257 = vmatpush.bf16.msrb.mxu3 %v1740_v16 }
  0xe8   :  { %1216 = vmatmul.bf16.vlgmr.msrb.gmra.mxu0 %v2236_v15  ;;  %1230 = vmatmul.bf16.vlgmr.msrb.gmra.mxu1 %v2238_v59 }
  0xe9   :  { %1244 = vmatmul.bf16.vlgmr.msrb.gmra.mxu2 %v2240_v43  ;;  %1258 = vmatmul.bf16.vlgmr.msrb.gmra.mxu3 %v2242_v60  ;;  %v393_v60 = vperm.slane %v390_v41, 1 }
 0x124   :  { %v1049_v17 = vpop.f32.mrf.mxu0  ;;  %v1063_v18 = vpop.f32.mrf.mxu1 }
 0x125   :  { %v1050_v27 = vadd.f32 %v1049_v17, %v392_v42 }
 0x127   :  { %v1064_v39 = vadd.f32 %v1063_v18, %v1050_v27 }
 0x12b   :  { %v1077_v19 = vpop.f32.mrf.mxu2  ;;  %v1091_v20 = vpop.f32.mrf.mxu3 }
 0x12c   :  { %v1051_v21 = vpop.f32.mrf.mxu0  ;;  %v1065_v22 = vpop.f32.mrf.mxu1  ;;  %v1078_v48 = vadd.f32 %v1077_v19, %v1064_v39 }
 0x12d   :  { %v1052_v54 = vadd.f32 %v1051_v21, %v392_v42 }
 0x12e   :  { %v1092_v61 = vadd.f32 %v1091_v20, %v1078_v48 }
 0x12f   :  { %v1066_v1 = vadd.f32 %v1065_v22, %v1052_v54 }
 0x130   :  { %v1264_v7 = vmul.f32 %v1092_v61, %v1092_v61 }
 0x133   :  { %v1079_v23 = vpop.f32.mrf.mxu2  ;;  %v1093_v24 = vpop.f32.mrf.mxu3 }
 0x134   :  { %v1105_v25 = vpop.f32.mrf.mxu0  ;;  %v1119_v26 = vpop.f32.mrf.mxu1  ;;  %v1080_v10 = vadd.f32 %v1079_v23, %v1066_v1 }
 0x135   :  { %v1106_v35 = vadd.f32 %v1105_v25, %v393_v60 }
 0x136   :  { %v1094_v18 = vadd.f32 %v1093_v24, %v1080_v10 }
 0x137   :  { %v1120_v37 = vadd.f32 %v1119_v26, %v1106_v35 }
 0x13b   :  { %v1133_v29 = vpop.f32.mrf.mxu2  ;;  %v1147_v30 = vpop.f32.mrf.mxu3 }
 0x13c   :  { %v1107_v31 = vpop.f32.mrf.mxu0  ;;  %v1121_v15 = vpop.f32.mrf.mxu1  ;;  %v1134_v40 = vadd.f32 %v1133_v29, %v1120_v37 }
 0x13d   :  { %v1108_v51 = vadd.f32 %v1107_v31, %v393_v60  ;;  %v1268_v31 = vmul.f32 %v1094_v18, %v1094_v18 }
 0x13e   :  { %v2260_v56 = vadd.f32 %v1147_v30, %v1134_v40 }
 0x13f   :  { %v1122_v63 = vadd.f32 %v1121_v15, %v1108_v51 }
 0x140   :  { %v1265_v3 = vmul.f32 %v2260_v56, %v2260_v56 }
 0x142   :  { %v1272_v55 = vadd.f32 %v1265_v3, %v1264_v7 }
 0x143   :  { %v1135_v34 = vpop.f32.mrf.mxu2  ;;  %v1149_v59 = vpop.f32.mrf.mxu3 }
 0x144   :  { %v1136_v4 = vadd.f32 %v1135_v34, %v1122_v63 }
 0x145   :  { %v1161_v38 = vpop.f32.mrf.mxu0  ;;  %v1175_v43 = vpop.f32.mrf.mxu1 }
 0x146   :  { %v1162_v28 = vadd.f32 %v1161_v38, %v394_v33  ;;  %v1150_v2 = vadd.f32 %v1149_v59, %v1136_v4 }
 0x148   :  { %v1176_v46 = vadd.f32 %v1175_v43, %v1162_v28  ;;  %v1269_v25 = vmul.f32 %v1150_v2, %v1150_v2 }
 0x14a   :  { %v1277_v38 = vadd.f32 %v1269_v25, %v1268_v31 }
 0x14d   :  { %v1163_v44 = vpop.f32.mrf.mxu0  ;;  %v1177_v36 = vpop.f32.mrf.mxu1 }
 0x14e   :  { %v1189_v45 = vpop.f32.mrf.mxu2  ;;  %v1203_v32 = vpop.f32.mrf.mxu3  ;;  %v1164_v57 = vadd.f32 %v1163_v44, %v394_v33 }
 0x14f   :  { %v1190_v52 = vadd.f32 %v1189_v45, %v1176_v46 }
 0x150   :  { %v1178_v5 = vadd.f32 %v1177_v36, %v1164_v57 }
 0x151   :  { %v1204_v0 = vadd.f32 %v1203_v32, %v1190_v52 }
 0x153   :  { %v1266_v11 = vmul.f32 %v1204_v0, %v1204_v0 }
 0x155   :  { %v1273_v21 = vadd.f32 %v1272_v55, %v1266_v11 }
 0x156   :  { %v1191_v49 = vpop.f32.mrf.mxu2  ;;  %v1205_v50 = vpop.f32.mrf.mxu3 }
 0x157   :  { %v1192_v12 = vadd.f32 %v1191_v49, %v1178_v5 }
 0x159   :  { %v1206_v19 = vadd.f32 %v1205_v50, %v1192_v12 }
 0x15b   :  { %v1270_v15 = vmul.f32 %v1206_v19, %v1206_v19 }
 0x15d   :  { %v1278_v59 = vadd.f32 %v1277_v38, %v1270_v15 }
 0x165   :  { %v1217_v53 = vpop.f32.mrf.mxu0  ;;  %v1231_v62 = vpop.f32.mrf.mxu1 }
 0x166   :  { %v1218_v58 = vadd.f32 %v1217_v53, %v395_v47 }
 0x168   :  { %v1232_v6 = vadd.f32 %v1231_v62, %v1218_v58 }
 0x16c   :  { %v1245_v8 = vpop.f32.mrf.mxu2  ;;  %v1259_v9 = vpop.f32.mrf.mxu3 }
 0x16d   :  { %v1246_v13 = vadd.f32 %v1245_v8, %v1232_v6  ;;  %v1219_v14 = vpop.f32.mrf.mxu0  ;;  %v1233_v22 = vpop.f32.mrf.mxu1 }
 0x16e   :  { %v1220_v17 = vadd.f32 %v1219_v14, %v395_v47 }
 0x16f   :  { %v1260_v16 = vadd.f32 %v1259_v9, %v1246_v13 }
 0x170   :  { %v1234_v26 = vadd.f32 %v1233_v22, %v1220_v17 }
 0x171   :  { %v1267_v20 = vmul.f32 %v1260_v16, %v1260_v16 }
 0x173   :  { %v1274_v29 = vadd.f32 %v1273_v21, %v1267_v20 }
 0x174   :  { %v1247_v30 = vpop.f32.mrf.mxu2  ;;  %v1261_v34 = vpop.f32.mrf.mxu3 }
 0x175   :  { %v1248_v23 = vadd.f32 %v1247_v30, %v1234_v26  ;;  %1275 = vadd.xlane.f32.xlu2 %v1274_v29 }
 0x177   :  { %v1262_v43 = vadd.f32 %v1261_v34, %v1248_v23 }
 0x179   :  { %v1271_v41 = vmul.f32 %v1262_v43, %v1262_v43 }
 0x17b   :  { %v1279_v60 = vadd.f32 %v1278_v59, %v1271_v41 }
 0x17d   :  { %1280 = vadd.xlane.f32.xlu0 %v1279_v60 }
 0x1e8   :  { %v1276_v24 = vpop.xlane.xlu2 %1275 }
 0x1e9   :  { %v1282_v42 = vmax.f32 %v1276_v24, 1e-24 }
 0x1eb   :  { %1993 = vrsqrt.f32 %v1282_v42  ;;  %vm1290_vm1 = vweird.f32 %v1282_v42 }
 0x1f0   :  { %v1281_v45 = vpop.xlane.xlu0 %1280 }
 0x1f1   :  { %v1994_v32 = vpop.eup %1993  ;;  %v1283_v33 = vmax.f32 %v1281_v45, 1e-24 }
 0x1f2   :  { %v1285_v35 = vmul.f32 %v1994_v32, %v1282_v42  ;;  %vm1291_vm0 = vweird.f32 %v1994_v32 }
 0x1f3   :  { %1995 = vrsqrt.f32 %v1283_v33  ;;  %vm1292_vm2 = vmor %vm1290_vm1, %vm1291_vm0  ;;  %vm1300_vm4 = vweird.f32 %v1283_v33 }
 0x1f4   :  { %v1286_v44 = vmul.f32 %v1994_v32, %v1285_v35 }
 0x1f6   :  { %v1287_v27 = vmul.f32 0.5, %v1286_v44 }
 0x1f8   :  { %v1288_v28 = vsub.f32 1.5, %v1287_v27 }
 0x1f9   :  { %v1996_v36 = vpop.eup %1995 }
 0x1fa   :  { %v1289_v37 = vmul.f32 %v1994_v32, %v1288_v28  ;;  %v1295_v39 = vmul.f32 %v1996_v36, %v1283_v33  ;;  %vm1301_vm3 = vweird.f32 %v1996_v36 }
 0x1fb   :  { %vm1302_vm5 = vmor %vm1300_vm4, %vm1301_vm3 }
 0x1fc   :  { %v1293_v40 = vsel %vm1292_vm2, %v1994_v32, %v1289_v37  ;;  %v1296_v46 = vmul.f32 %v1996_v36, %v1295_v39 }
 0x1fd   :  { %v1304_v47 = vmul.f32 %v1293_v40, %v1092_v61  ;;  %v1305_v48 = vmul.f32 %v1293_v40, %v2260_v56  ;;  %v1306_v49 = vmul.f32 %v1293_v40, %v1204_v0  ;;  %v1307_v50 = vmul.f32 %v1293_v40, %v1260_v16 }
 0x1fe   :  { %v1297_v51 = vmul.f32 0.5, %v1296_v46 }
 0x1ff   :  { %1312 = vst [vmem:[#allocation11] sm:$0xff] %v1304_v47 }
 0x200   :  { %1313 = vst [vmem:[#allocation11 + $0x8] sm:$0xff] %v1305_v48  ;;  %v1298_v52 = vsub.f32 1.5, %v1297_v51 }
 0x201   :  { %1314 = vst [vmem:[#allocation11 + $0x10] sm:$0xff] %v1306_v49 }
 0x202   :  { %1315 = vst [vmem:[#allocation11 + $0x18] sm:$0xff] %v1307_v50  ;;  %v1299_v53 = vmul.f32 %v1996_v36, %v1298_v52 }
 0x204   :  { %v1303_v54 = vsel %vm1302_vm5, %v1996_v36, %v1299_v53 }
 0x205   :  { %v1308_v56 = vmul.f32 %v1303_v54, %v1094_v18  ;;  %v1309_v57 = vmul.f32 %v1303_v54, %v1150_v2  ;;  %v1310_v58 = vmul.f32 %v1303_v54, %v1206_v19  ;;  %v1311_v61 = vmul.f32 %v1303_v54, %v1262_v43 }
 0x207   :  { %1316 = vst [vmem:[#allocation11 + $0x20] sm:$0xff] %v1308_v56 }
 0x208   :  { %1317 = vst [vmem:[#allocation11 + $0x28] sm:$0xff] %v1309_v57 }
 0x209   :  { %1318 = vst [vmem:[#allocation11 + $0x30] sm:$0xff] %v1310_v58 }
 0x20a   :  { %1319 = vst [vmem:[#allocation11 + $0x38] sm:$0xff] %v1311_v61 }
 0x20b   :  { %1332 = dma.vmem_to_hbm [thread:$0]  %s1325_s4, 1024, %s1327_s21, [#allocation4], %s2159_s22, %s2159_s22, %s2160_s23  }
 0x20c   :  { %2147 = dma.done.wait [#allocation4], 1024  }
 0x20d   :  { %2148 = vsyncadd [#allocation4], 4294966272 }
 0x20e   :  { %1337 = vsyncpa [#allocation3], 1 }
 0x20f   :  { %1338 = vsyncpa [#allocation6], 1 }
 0x210   :  { %1339 = vsyncpa [#allocation9], 1 }
 0x211   :  { %1340 = vsyncpa [#allocation4], 1 }

</bundles_post_ra>
